<compile_context>
chip_gen: v6e
topology: v6e:2x2x1
jax: 0.10.0
libtpu: 0.0.40
codegen_flags: <defaults>
</compile_context>

<pallas_src>
import math
import numpy as np
import jax
import jax.numpy as jnp
from jax import lax
from jax.experimental import pallas as pl
from jax.experimental.pallas import tpu as pltpu

# ---------------- config (small, consistent with the module) ----------------
HIDDEN = 32
N_HEADS = 4
HEAD = HIDDEN // N_HEADS            # 8
N_LAYERS = 2
N_CLUSTERS = 16
N_PIXELS = 4
SEQ = N_PIXELS * N_PIXELS           # 16
BATCH = 2
BS = BATCH * SEQ                    # 32 rows: batch folded into the sublane axis
PADC = 128                          # lane-padded logit width (lane-dense store)
EPS = 1e-5
NEG = -1e30                         # large finite "masked" value (== -inf result)
SCALE = 1.0 / math.sqrt(HEAD)

HEAD_SHIFT = HEAD.bit_length() - 1  # 3
BS_SHIFT = BS.bit_length() - 1      # 5
SEQ_SHIFT = SEQ.bit_length() - 1    # 4

# ---------------------------- packed slab layout -----------------------------
# f32 slab (F32_ROWS, 128):
#   rows 0:BS         cols 0:H    -> per-row additive embedding (start | pos[s-1])
#   rows BS:BS+4L+1   full 128    -> packed LN weights / biases ("vecs"):
#       row 4l  : [ln1_w | ln1_b | ln2_w | ln2_b]
#       row 4l+1: [bq | bk | bv | bp]   (Linear biases are 0 per _init_weights)
#       row 4l+2: b1 (128 wide)
#       row 4l+3: [b2 | 0...]
#       last row: [lnf_w | lnf_b | 0...]
F32_POS = 0
F32_VEC = BS
F32_ROWS = BS + 4 * N_LAYERS + 1                      # 41

# bf16 slab (BF_ROWS, 128):
#   rows 0:16                       cols 0:32  -> pix embedding table
#   per layer l, base = 16 + 224*l:
#     rows base       : base+32     cols 0:96  -> fused QKV weight (scale in Q)
#     rows base+32    : base+64     cols 0:32  -> output projection Wp
#     rows base+64    : base+96     cols 0:128 -> MLP W1
#     rows base+96    : base+224    cols 0:32  -> MLP W2
#   rows 464:496                    cols 0:128 -> zero-padded head weight
LAYER_ROWS = 3 * HIDDEN + 4 * HIDDEN                  # 224
BF_PIX = 0
BF_LAYER = N_CLUSTERS                                 # 16
BF_HEAD = N_CLUSTERS + N_LAYERS * LAYER_ROWS          # 464
BF_ROWS = BF_HEAD + HIDDEN                            # 496


def _layernorm(x, w, b):
    mu = jnp.mean(x, axis=-1, keepdims=True)
    var = jnp.mean((x - mu) ** 2, axis=-1, keepdims=True)
    return (x - mu) * lax.rsqrt(var + EPS) * w + b


def _gelu_exact(x):
    return 0.5 * x * (1.0 + lax.erf(x * (1.0 / math.sqrt(2.0))))


# ------------------------------- the kernel ---------------------------------
def imagegpt_kernel(tok_ref, f32_ref, bf_ref, out_ref):
    f32 = jnp.float32
    bf16 = jnp.bfloat16

    pos_start = f32_ref[F32_POS:F32_POS + BS, 0:HIDDEN]            # (BS, H) f32
    V = f32_ref[F32_VEC:F32_VEC + 4 * N_LAYERS + 1, :]             # (4L+1, 128) f32
    pix = bf_ref[BF_PIX:BF_PIX + N_CLUSTERS, 0:HIDDEN]             # (16, H) bf16

    # ---- embedding: one-hot(shifted tokens) @ pix_table + (start | pos) ----
    tok = tok_ref[...]                                             # (BS, 1) int32, -1 at row 0 of each image
    cl = lax.broadcasted_iota(jnp.int32, (BS, N_CLUSTERS), 1)
    onehot = jnp.where(cl == tok, 1.0, 0.0).astype(bf16)           # (BS, 16)
    x = jnp.dot(onehot, pix, preferred_element_type=f32) + pos_start

    # ---- masks generated in-kernel from iota compares (no HBM traffic) ----
    # additive attention bias (causal AND same-image), tiled once per head
    row = lax.broadcasted_iota(jnp.int32, (BS, N_HEADS * BS), 0)
    col = lax.broadcasted_iota(jnp.int32, (BS, N_HEADS * BS), 1)
    t = col & (BS - 1)                                             # position within the head block
    allowed = ((row >> SEQ_SHIFT) == (t >> SEQ_SHIFT)) & (t <= row)
    attn_bias = jnp.where(allowed, 0.0, NEG)                       # (BS, NH*BS) f32

    # block-structure masks for the all-head score / P@V matmuls
    d_i = lax.broadcasted_iota(jnp.int32, (HIDDEN, N_HEADS * BS), 0)
    c_i = lax.broadcasted_iota(jnp.int32, (HIDDEN, N_HEADS * BS), 1)
    maskk = jnp.where((d_i >> HEAD_SHIFT) == (c_i >> BS_SHIFT), 1.0, 0.0)   # (H, NH*BS)

    r_i = lax.broadcasted_iota(jnp.int32, (N_HEADS * BS, HIDDEN), 0)
    j_i = lax.broadcasted_iota(jnp.int32, (N_HEADS * BS, HIDDEN), 1)
    maskv = jnp.where((r_i >> BS_SHIFT) == (j_i >> HEAD_SHIFT), 1.0, 0.0)   # (NH*BS, H)

    for l in range(N_LAYERS):
        r0 = 4 * l
        ln1_w = V[r0:r0 + 1, 0:HIDDEN]
        ln1_b = V[r0:r0 + 1, HIDDEN:2 * HIDDEN]
        ln2_w = V[r0:r0 + 1, 2 * HIDDEN:3 * HIDDEN]
        ln2_b = V[r0:r0 + 1, 3 * HIDDEN:4 * HIDDEN]
        bqkv = V[r0 + 1:r0 + 2, 0:3 * HIDDEN]
        bp = V[r0 + 1:r0 + 2, 3 * HIDDEN:4 * HIDDEN]
        b1 = V[r0 + 2:r0 + 3, :]
        b2 = V[r0 + 3:r0 + 4, 0:HIDDEN]

        base = BF_LAYER + l * LAYER_ROWS
        wqkv = bf_ref[base:base + HIDDEN, 0:3 * HIDDEN]                      # (H, 3H)
        wp = bf_ref[base + HIDDEN:base + 2 * HIDDEN, 0:HIDDEN]               # (H, H)
        w1 = bf_ref[base + 2 * HIDDEN:base + 3 * HIDDEN, :]                  # (H, 4H)
        w2 = bf_ref[base + 3 * HIDDEN:base + 7 * HIDDEN, 0:HIDDEN]           # (4H, H)

        # -------- attention sub-layer (residual adds to the LN'ed input) ----
        xn = _layernorm(x, ln1_w, ln1_b)
        qkv = jnp.dot(xn.astype(bf16), wqkv, preferred_element_type=f32) + bqkv  # (BS, 3H)
        q = qkv[:, 0:HIDDEN]                        # 1/sqrt(head) already folded into Wq
        k = qkv[:, HIDDEN:2 * HIDDEN]
        v = qkv[:, 2 * HIDDEN:3 * HIDDEN]

        # block-structured K so a single matmul covers all heads:
        #   kbig[d, h*BS + t] = k[t, d] if d in head h else 0
        # block-structured [V | ones] so one matmul gives outputs AND denominators:
        #   vbig[h*BS + t, j]     = v[t, j] if j in head h else 0      (cols 0:H)
        #   vbig[h*BS + t, H + j] = 1       if j in head h else 0      (cols H:2H)
        # (replicate/mask in f32 then cast: v5e has no bf16 VALU)
        kbig = (jnp.concatenate([k.T] * N_HEADS, axis=1) * maskk).astype(bf16)    # (H, NH*BS)
        vbig = jnp.concatenate(
            [jnp.concatenate([v] * N_HEADS, axis=0) * maskv, maskv],
            axis=1).astype(bf16)                                                  # (NH*BS, 2H)

        # all-head scores in one lane-dense (BS, 128) matmul
        s = jnp.dot(q.astype(bf16), kbig, preferred_element_type=f32) + attn_bias

        # single row-wide max: the constant per-row shift cancels inside each
        # head's softmax (safe unless heads differ by >~80 in one row).
        m = jnp.max(s, axis=-1, keepdims=True)
        e = jnp.exp(s - m)                                                        # masked -> 0

        # fused all-head P@V + softmax denominator in ONE (BS,128)@(128,2H) dot
        pv = jnp.dot(e.astype(bf16), vbig, preferred_element_type=f32)            # (BS, 2H)
        o = pv[:, 0:HIDDEN] * pl.reciprocal(pv[:, HIDDEN:2 * HIDDEN], approx=True)

        att = jnp.dot(o.astype(bf16), wp, preferred_element_type=f32) + bp
        x = att + xn

        # ------------------------------ MLP ---------------------------------
        xn = _layernorm(x, ln2_w, ln2_b)
        h1 = _gelu_exact(jnp.dot(xn.astype(bf16), w1, preferred_element_type=f32) + b1)
        h2 = jnp.dot(h1.astype(bf16), w2, preferred_element_type=f32) + b2
        x = h2 + xn

    # -------------------------- final LN + head ------------------------------
    rf = 4 * N_LAYERS
    lnf_w = V[rf:rf + 1, 0:HIDDEN]
    lnf_b = V[rf:rf + 1, HIDDEN:2 * HIDDEN]
    xf = _layernorm(x, lnf_w, lnf_b)
    whead = bf_ref[BF_HEAD:BF_HEAD + HIDDEN, :]                     # (H, 128) zero-padded
    # 128-wide logits -> unmasked lane-dense store; wrapper slices to 16 classes.
    out_ref[...] = jnp.dot(xf.astype(bf16), whead, preferred_element_type=f32)


# ------------------------------- the wrapper ---------------------------------
@jax.jit
def imagegpt_forward(tokens, params):
    """tokens: (B, S) int32 in [0, N_CLUSTERS). Returns logits (B, S, N_CLUSTERS)."""
    B, S = tokens.shape
    bs = B * S
    # start-of-image shift: row s uses token s-1; row 0 uses the start vector.
    # -1 sentinel -> all-zero one-hot row (start vector added via pos_start).
    # TODO(synk): this tiny (B,S) int32 shift stays as one XLA concat in the wrapper.
    tok_shift = jnp.concatenate(
        [jnp.full((B, 1), -1, dtype=jnp.int32), tokens[:, :-1].astype(jnp.int32)],
        axis=1).reshape(bs, 1)

    vmem = pl.BlockSpec(memory_space=pltpu.MemorySpace.VMEM)
    out = pl.pallas_call(
        imagegpt_kernel,
        # No grid: one invocation, whole arrays resident in VMEM (no useless
        # double-buffering / pipeline bookkeeping for a single-step kernel).
        in_specs=[vmem, vmem, vmem],
        out_specs=vmem,
        out_shape=jax.ShapeDtypeStruct((bs, PADC), jnp.float32),
    )(tok_shift, params["slab_f32"], params["slab_bf16"])

    return out[:, :N_CLUSTERS].reshape(B, S, N_CLUSTERS)


# ------------------------------ parameter setup -------------------------------
def init_params(key):
    std = 0.02
    ks = jax.random.split(key, 4 + 6 * N_LAYERS)
    ki = iter(ks)

    pix_table = std * jax.random.normal(next(ki), (N_CLUSTERS, HIDDEN), jnp.float32)
    pos_table = std * jax.random.normal(next(ki), (N_PIXELS ** 2, HIDDEN), jnp.float32)
    start = jax.random.normal(next(ki), (HIDDEN,), jnp.float32)
    Whead = std * jax.random.normal(next(ki), (N_CLUSTERS, HIDDEN), jnp.float32)

    # permutation reproducing the PyTorch key view/transpose quirk:
    # perm[h*HEAD + d] = d*N_HEADS + h
    perm = jnp.arange(HIDDEN).reshape(HEAD, N_HEADS).T.reshape(-1)

    raw_layers = []
    wqkv_l, wp_l, w1_l, w2_l = [], [], [], []
    for _ in range(N_LAYERS):
        Wq = std * jax.random.normal(next(ki), (HIDDEN, HIDDEN), jnp.float32)
        Wk = std * jax.random.normal(next(ki), (HIDDEN, HIDDEN), jnp.float32)
        Wv = std * jax.random.normal(next(ki), (HIDDEN, HIDDEN), jnp.float32)
        Wp = std * jax.random.normal(next(ki), (HIDDEN, HIDDEN), jnp.float32)
        W1 = std * jax.random.normal(next(ki), (4 * HIDDEN, HIDDEN), jnp.float32)
        W2 = std * jax.random.normal(next(ki), (HIDDEN, 4 * HIDDEN), jnp.float32)
        raw_layers.append(dict(Wq=Wq, Wk=Wk, Wv=Wv, Wp=Wp, W1=W1, W2=W2))
        # fused QKV weight, (in, out) layout. 1/sqrt(head) folded into the Q
        # columns; K columns permuted to fold the PyTorch key head-interleaving.
        wqkv_l.append(jnp.concatenate([Wq.T * SCALE, Wk[perm, :].T, Wv.T], axis=1))  # (H, 3H)
        wp_l.append(Wp.T)          # (H, H)
        w1_l.append(W1.T)          # (H, 4H)
        w2_l.append(W2.T)          # (4H, H)

    # packed per-layer LN weights / biases (Linear biases are 0 per _init_weights)
    vecs = np.zeros((4 * N_LAYERS + 1, 4 * HIDDEN), np.float32)
    for l in range(N_LAYERS):
        vecs[4 * l, 0:HIDDEN] = 1.0                     # ln_1 weight
        vecs[4 * l, 2 * HIDDEN:3 * HIDDEN] = 1.0        # ln_2 weight
    vecs[4 * N_LAYERS, 0:HIDDEN] = 1.0                  # ln_f weight

    # per-row additive embedding term: start vector at position 0, else pos[s-1].
    per_seq = jnp.concatenate([start[None, :], pos_table[:SEQ - 1]], axis=0)   # (SEQ, H)
    pos_start = np.asarray(jnp.tile(per_seq, (BATCH, 1)))                      # (BS, H)

    # ---- f32 slab ----
    slab_f32 = np.zeros((F32_ROWS, PADC), np.float32)
    slab_f32[F32_POS:F32_POS + BS, 0:HIDDEN] = pos_start
    slab_f32[F32_VEC:F32_VEC + 4 * N_LAYERS + 1, :] = vecs

    # ---- bf16 slab ----
    slab_bf16 = np.zeros((BF_ROWS, PADC), np.float32)
    slab_bf16[BF_PIX:BF_PIX + N_CLUSTERS, 0:HIDDEN] = np.asarray(pix_table)
    for l in range(N_LAYERS):
        base = BF_LAYER + l * LAYER_ROWS
        slab_bf16[base:base + HIDDEN, 0:3 * HIDDEN] = np.asarray(wqkv_l[l])
        slab_bf16[base + HIDDEN:base + 2 * HIDDEN, 0:HIDDEN] = np.asarray(wp_l[l])
        slab_bf16[base + 2 * HIDDEN:base + 3 * HIDDEN, :] = np.asarray(w1_l[l])
        slab_bf16[base + 3 * HIDDEN:base + 7 * HIDDEN, 0:HIDDEN] = np.asarray(w2_l[l])
    slab_bf16[BF_HEAD:BF_HEAD + HIDDEN, 0:N_CLUSTERS] = np.asarray(Whead.T)

    params = dict(
        slab_f32=jnp.asarray(slab_f32),
        slab_bf16=jnp.asarray(slab_bf16, dtype=jnp.bfloat16),
    )
    raw = dict(pix_table=pix_table, pos_table=pos_table, start=start,
               Whead=Whead, layers=raw_layers)
    return params, raw


# --------------------- pure-JAX reference (f32, PyTorch-faithful) -------------
def imagegpt_reference(tokens, raw):
    B, S = tokens.shape
    ones = jnp.ones((HIDDEN,), jnp.float32)
    zeros = jnp.zeros((HIDDEN,), jnp.float32)

    pix = raw["pix_table"][tokens]
    pos = raw["pos_table"][:S]
    emb = pix + pos[None, :, :]
    start = jnp.broadcast_to(raw["start"][None, None, :], (B, 1, HIDDEN))
    x = jnp.concatenate([start, emb[:, :-1, :]], axis=1)

    rr = jnp.arange(S)[:, None]
    cc = jnp.arange(S)[None, :]
    mask_add = jnp.where(cc <= rr, 0.0, NEG).astype(jnp.float32)

    for l in range(N_LAYERS):
        W = raw["layers"][l]
        xn = _layernorm(x, ones, zeros)
        q = xn @ W["Wq"].T
        k = xn @ W["Wk"].T
        v = xn @ W["Wv"].T
        qh = jnp.transpose(q.reshape(B, S, N_HEADS, HEAD), (0, 2, 1, 3))
        kh = jnp.transpose(k.reshape(B, S, HEAD, N_HEADS), (0, 3, 2, 1))
        vh = jnp.transpose(v.reshape(B, S, N_HEADS, HEAD), (0, 2, 1, 3))
        sc = jnp.einsum('bhrd,bhdt->bhrt', qh, kh) / math.sqrt(HEAD) + mask_add[None, None]
        p = jax.nn.softmax(sc, axis=-1)
        o = jnp.einsum('bhrt,bhtd->bhrd', p, vh)
        o = jnp.transpose(o, (0, 2, 1, 3)).reshape(B, S, HIDDEN)
        x = o @ W["Wp"].T + xn
        xn = _layernorm(x, ones, zeros)
        h1 = jax.nn.gelu(xn @ W["W1"].T, approximate=False)
        x = h1 @ W["W2"].T + xn

    x = _layernorm(x, ones, zeros)
    return x @ raw["Whead"].T


if __name__ == "__main__":
    key = jax.random.PRNGKey(0)
    pkey, tkey = jax.random.split(key)
    params, raw = init_params(pkey)
    tokens = jax.random.randint(tkey, (BATCH, SEQ), 0, N_CLUSTERS, dtype=jnp.int32)

    logits = imagegpt_forward(tokens, params)
    jax.block_until_ready(logits)

    assert logits.shape == (BATCH, SEQ, N_CLUSTERS)
    assert logits.dtype == jnp.float32
    assert bool(jnp.all(jnp.isfinite(logits)))

    ref = imagegpt_reference(tokens, raw)
    err = float(jnp.max(jnp.abs(logits - ref)))
    assert err < 3e-2, f"max abs err vs reference: {err}"

    print("KERNEL_OK")
</pallas_src>

<mosaic_0001>
module attributes {stable_mosaic.version = 11 : i64} {
  func.func @imagegpt_kernel(%arg0: memref<32x1xi32, #tpu.memory_space<vmem>>, %arg1: memref<41x128xf32, #tpu.memory_space<vmem>>, %arg2: memref<496x128xbf16, #tpu.memory_space<vmem>>, %arg3: memref<32x128xf32, #tpu.memory_space<vmem>>) attributes {dimension_semantics = [], scalar_prefetch = 0 : i64, scratch_operands = 0 : i64, tpu.core_type = #tpu.core_type<tc>} {
    %c0 = arith.constant 0 : index
    %c0_0 = arith.constant 0 : index
    %0 = vector.load %arg1[%c0, %c0_0] : memref<41x128xf32, #tpu.memory_space<vmem>>, vector<32x32xf32>
    %c32 = arith.constant 32 : index
    %c0_1 = arith.constant 0 : index
    %1 = vector.load %arg1[%c32, %c0_1] : memref<41x128xf32, #tpu.memory_space<vmem>>, vector<9x128xf32>
    %c0_2 = arith.constant 0 : index
    %c0_3 = arith.constant 0 : index
    %2 = vector.load %arg2[%c0_2, %c0_3] : memref<496x128xbf16, #tpu.memory_space<vmem>>, vector<16x32xbf16>
    %c0_4 = arith.constant 0 : index
    %c0_5 = arith.constant 0 : index
    %3 = vector.load %arg0[%c0_4, %c0_5] : memref<32x1xi32, #tpu.memory_space<vmem>>, vector<32x1xi32>
    %4 = tpu.iota {dimensions = array<i32: 1>} : vector<32x16xi32>
    %5 = vector.broadcast %3 : vector<32x1xi32> to vector<32x16xi32>
    %6 = arith.cmpi eq, %4, %5 : vector<32x16xi32>
    %cst = arith.constant 1.000000e+00 : f32
    %cst_6 = arith.constant 0.000000e+00 : f32
    %7 = vector.broadcast %cst : f32 to vector<32x16xf32>
    %8 = vector.broadcast %cst_6 : f32 to vector<32x16xf32>
    %9 = arith.select %6, %7, %8 : vector<32x16xi1>, vector<32x16xf32>
    %10 = arith.truncf %9 : vector<32x16xf32> to vector<32x16xbf16>
    %cst_7 = arith.constant dense<0.000000e+00> : vector<32x32xf32>
    %11 = tpu.matmul %10, %2, %cst_7 {dimension_numbers = #tpu.dot_dimension_numbers<[1], [0], [0], [1], [0, 0, 1, 1], [], []>} : vector<32x16xbf16>, vector<16x32xbf16>, vector<32x32xf32> -> vector<32x32xf32>
    %12 = arith.addf %11, %0 : vector<32x32xf32>
    %13 = tpu.iota {dimensions = array<i32: 0>} : vector<32x128xi32>
    %14 = tpu.iota {dimensions = array<i32: 1>} : vector<32x128xi32>
    %c31_i32 = arith.constant 31 : i32
    %15 = vector.broadcast %c31_i32 : i32 to vector<32x128xi32>
    %16 = arith.andi %14, %15 : vector<32x128xi32>
    %c4_i32 = arith.constant 4 : i32
    %17 = vector.broadcast %c4_i32 : i32 to vector<32x128xi32>
    %18 = arith.shrsi %13, %17 : vector<32x128xi32>
    %c4_i32_8 = arith.constant 4 : i32
    %19 = vector.broadcast %c4_i32_8 : i32 to vector<32x128xi32>
    %20 = arith.shrsi %16, %19 : vector<32x128xi32>
    %21 = arith.cmpi eq, %18, %20 : vector<32x128xi32>
    %22 = arith.cmpi sle, %16, %13 : vector<32x128xi32>
    %23 = arith.andi %21, %22 : vector<32x128xi1>
    %cst_9 = arith.constant 0.000000e+00 : f32
    %cst_10 = arith.constant -1.000000e+30 : f32
    %24 = vector.broadcast %cst_9 : f32 to vector<32x128xf32>
    %25 = vector.broadcast %cst_10 : f32 to vector<32x128xf32>
    %26 = arith.select %23, %24, %25 : vector<32x128xi1>, vector<32x128xf32>
    %27 = tpu.iota {dimensions = array<i32: 0>} : vector<32x128xi32>
    %28 = tpu.iota {dimensions = array<i32: 1>} : vector<32x128xi32>
    %c3_i32 = arith.constant 3 : i32
    %29 = vector.broadcast %c3_i32 : i32 to vector<32x128xi32>
    %30 = arith.shrsi %27, %29 : vector<32x128xi32>
    %c5_i32 = arith.constant 5 : i32
    %31 = vector.broadcast %c5_i32 : i32 to vector<32x128xi32>
    %32 = arith.shrsi %28, %31 : vector<32x128xi32>
    %33 = arith.cmpi eq, %30, %32 : vector<32x128xi32>
    %cst_11 = arith.constant 1.000000e+00 : f32
    %cst_12 = arith.constant 0.000000e+00 : f32
    %34 = vector.broadcast %cst_11 : f32 to vector<32x128xf32>
    %35 = vector.broadcast %cst_12 : f32 to vector<32x128xf32>
    %36 = arith.select %33, %34, %35 : vector<32x128xi1>, vector<32x128xf32>
    %37 = tpu.iota {dimensions = array<i32: 0>} : vector<128x32xi32>
    %38 = tpu.iota {dimensions = array<i32: 1>} : vector<128x32xi32>
    %c5_i32_13 = arith.constant 5 : i32
    %39 = vector.broadcast %c5_i32_13 : i32 to vector<128x32xi32>
    %40 = arith.shrsi %37, %39 : vector<128x32xi32>
    %c3_i32_14 = arith.constant 3 : i32
    %41 = vector.broadcast %c3_i32_14 : i32 to vector<128x32xi32>
    %42 = arith.shrsi %38, %41 : vector<128x32xi32>
    %43 = arith.cmpi eq, %40, %42 : vector<128x32xi32>
    %cst_15 = arith.constant 1.000000e+00 : f32
    %cst_16 = arith.constant 0.000000e+00 : f32
    %44 = vector.broadcast %cst_15 : f32 to vector<128x32xf32>
    %45 = vector.broadcast %cst_16 : f32 to vector<128x32xf32>
    %46 = arith.select %43, %44, %45 : vector<128x32xi1>, vector<128x32xf32>
    %47 = vector.extract_strided_slice %1 {offsets = [0, 0], sizes = [1, 32], strides = [1, 1]} : vector<9x128xf32> to vector<1x32xf32>
    %48 = vector.extract_strided_slice %1 {offsets = [0, 32], sizes = [1, 32], strides = [1, 1]} : vector<9x128xf32> to vector<1x32xf32>
    %49 = vector.extract_strided_slice %1 {offsets = [0, 64], sizes = [1, 32], strides = [1, 1]} : vector<9x128xf32> to vector<1x32xf32>
    %50 = vector.extract_strided_slice %1 {offsets = [0, 96], sizes = [1, 32], strides = [1, 1]} : vector<9x128xf32> to vector<1x32xf32>
    %51 = vector.extract_strided_slice %1 {offsets = [1, 0], sizes = [1, 96], strides = [1, 1]} : vector<9x128xf32> to vector<1x96xf32>
    %52 = vector.extract_strided_slice %1 {offsets = [1, 96], sizes = [1, 32], strides = [1, 1]} : vector<9x128xf32> to vector<1x32xf32>
    %53 = vector.extract_strided_slice %1 {offsets = [2, 0], sizes = [1, 128], strides = [1, 1]} : vector<9x128xf32> to vector<1x128xf32>
    %54 = vector.extract_strided_slice %1 {offsets = [3, 0], sizes = [1, 32], strides = [1, 1]} : vector<9x128xf32> to vector<1x32xf32>
    %c16 = arith.constant 16 : index
    %c0_17 = arith.constant 0 : index
    %55 = vector.load %arg2[%c16, %c0_17] : memref<496x128xbf16, #tpu.memory_space<vmem>>, vector<32x96xbf16>
    %c48 = arith.constant 48 : index
    %c0_18 = arith.constant 0 : index
    %56 = vector.load %arg2[%c48, %c0_18] : memref<496x128xbf16, #tpu.memory_space<vmem>>, vector<32x32xbf16>
    %c80 = arith.constant 80 : index
    %c0_19 = arith.constant 0 : index
    %57 = vector.load %arg2[%c80, %c0_19] : memref<496x128xbf16, #tpu.memory_space<vmem>>, vector<32x128xbf16>
    %c112 = arith.constant 112 : index
    %c0_20 = arith.constant 0 : index
    %58 = vector.load %arg2[%c112, %c0_20] : memref<496x128xbf16, #tpu.memory_space<vmem>>, vector<128x32xbf16>
    %cst_21 = arith.constant dense<0.000000e+00> : vector<32xf32>
    %59 = vector.multi_reduction <add>, %12, %cst_21 [1] : vector<32x32xf32> to vector<32xf32>
    %60 = vector.shape_cast %59 : vector<32xf32> to vector<32x1xf32>
    %cst_22 = arith.constant 3.200000e+01 : f32
    %61 = vector.broadcast %cst_22 : f32 to vector<32x1xf32>
    %62 = arith.divf %60, %61 : vector<32x1xf32>
    %63 = vector.broadcast %62 : vector<32x1xf32> to vector<32x32xf32>
    %64 = arith.subf %12, %63 : vector<32x32xf32>
    %65 = arith.mulf %64, %64 : vector<32x32xf32>
    %cst_23 = arith.constant dense<0.000000e+00> : vector<32xf32>
    %66 = vector.multi_reduction <add>, %65, %cst_23 [1] : vector<32x32xf32> to vector<32xf32>
    %67 = vector.shape_cast %66 : vector<32xf32> to vector<32x1xf32>
    %cst_24 = arith.constant 3.200000e+01 : f32
    %68 = vector.broadcast %cst_24 : f32 to vector<32x1xf32>
    %69 = arith.divf %67, %68 : vector<32x1xf32>
    %70 = vector.broadcast %62 : vector<32x1xf32> to vector<32x32xf32>
    %71 = arith.subf %12, %70 : vector<32x32xf32>
    %cst_25 = arith.constant 9.99999974E-6 : f32
    %72 = vector.broadcast %cst_25 : f32 to vector<32x1xf32>
    %73 = arith.addf %69, %72 : vector<32x1xf32>
    %74 = math.rsqrt %73 : vector<32x1xf32>
    %75 = vector.broadcast %74 : vector<32x1xf32> to vector<32x32xf32>
    %76 = arith.mulf %71, %75 : vector<32x32xf32>
    %77 = vector.broadcast %47 : vector<1x32xf32> to vector<32x32xf32>
    %78 = arith.mulf %76, %77 : vector<32x32xf32>
    %79 = vector.broadcast %48 : vector<1x32xf32> to vector<32x32xf32>
    %80 = arith.addf %78, %79 : vector<32x32xf32>
    %81 = arith.truncf %80 : vector<32x32xf32> to vector<32x32xbf16>
    %cst_26 = arith.constant dense<0.000000e+00> : vector<32x96xf32>
    %82 = tpu.matmul %81, %55, %cst_26 {dimension_numbers = #tpu.dot_dimension_numbers<[1], [0], [0], [1], [0, 0, 1, 1], [], []>} : vector<32x32xbf16>, vector<32x96xbf16>, vector<32x96xf32> -> vector<32x96xf32>
    %83 = vector.broadcast %51 : vector<1x96xf32> to vector<32x96xf32>
    %84 = arith.addf %82, %83 : vector<32x96xf32>
    %85 = vector.extract_strided_slice %84 {offsets = [0, 0], sizes = [32, 32], strides = [1, 1]} : vector<32x96xf32> to vector<32x32xf32>
    %86 = vector.extract_strided_slice %84 {offsets = [0, 32], sizes = [32, 32], strides = [1, 1]} : vector<32x96xf32> to vector<32x32xf32>
    %87 = vector.extract_strided_slice %84 {offsets = [0, 64], sizes = [32, 32], strides = [1, 1]} : vector<32x96xf32> to vector<32x32xf32>
    %88 = tpu.transpose %86, [1, 0] : vector<32x32xf32> -> vector<32x32xf32>
    %89 = tpu.concatenate %88, %88, %88, %88 in 1 : vector<32x32xf32>, vector<32x32xf32>, vector<32x32xf32>, vector<32x32xf32> -> vector<32x128xf32>
    %90 = arith.mulf %89, %36 : vector<32x128xf32>
    %91 = arith.truncf %90 : vector<32x128xf32> to vector<32x128xbf16>
    %92 = tpu.concatenate %87, %87, %87, %87 in 0 : vector<32x32xf32>, vector<32x32xf32>, vector<32x32xf32>, vector<32x32xf32> -> vector<128x32xf32>
    %93 = arith.mulf %92, %46 : vector<128x32xf32>
    %94 = tpu.concatenate %93, %46 in 1 : vector<128x32xf32>, vector<128x32xf32> -> vector<128x64xf32>
    %95 = arith.truncf %94 : vector<128x64xf32> to vector<128x64xbf16>
    %96 = arith.truncf %85 : vector<32x32xf32> to vector<32x32xbf16>
    %cst_27 = arith.constant dense<0.000000e+00> : vector<32x128xf32>
    %97 = tpu.matmul %96, %91, %cst_27 {dimension_numbers = #tpu.dot_dimension_numbers<[1], [0], [0], [1], [0, 0, 1, 1], [], []>} : vector<32x32xbf16>, vector<32x128xbf16>, vector<32x128xf32> -> vector<32x128xf32>
    %98 = arith.addf %97, %26 : vector<32x128xf32>
    %cst_28 = arith.constant dense<0xFF800000> : vector<32xf32>
    %99 = vector.multi_reduction <maximumf>, %98, %cst_28 [1] : vector<32x128xf32> to vector<32xf32>
    %100 = vector.shape_cast %99 : vector<32xf32> to vector<32x1xf32>
    %101 = vector.broadcast %100 : vector<32x1xf32> to vector<32x128xf32>
    %102 = arith.subf %98, %101 : vector<32x128xf32>
    %103 = math.exp %102 : vector<32x128xf32>
    %104 = arith.truncf %103 : vector<32x128xf32> to vector<32x128xbf16>
    %cst_29 = arith.constant dense<0.000000e+00> : vector<32x64xf32>
    %105 = tpu.matmul %104, %95, %cst_29 {dimension_numbers = #tpu.dot_dimension_numbers<[1], [0], [0], [1], [0, 0, 1, 1], [], []>} : vector<32x128xbf16>, vector<128x64xbf16>, vector<32x64xf32> -> vector<32x64xf32>
    %106 = vector.extract_strided_slice %105 {offsets = [0, 0], sizes = [32, 32], strides = [1, 1]} : vector<32x64xf32> to vector<32x32xf32>
    %107 = vector.extract_strided_slice %105 {offsets = [0, 32], sizes = [32, 32], strides = [1, 1]} : vector<32x64xf32> to vector<32x32xf32>
    %108 = tpu.reciprocal %107 {approx = true} : vector<32x32xf32> -> vector<32x32xf32>
    %109 = arith.mulf %106, %108 : vector<32x32xf32>
    %110 = arith.truncf %109 : vector<32x32xf32> to vector<32x32xbf16>
    %cst_30 = arith.constant dense<0.000000e+00> : vector<32x32xf32>
    %111 = tpu.matmul %110, %56, %cst_30 {dimension_numbers = #tpu.dot_dimension_numbers<[1], [0], [0], [1], [0, 0, 1, 1], [], []>} : vector<32x32xbf16>, vector<32x32xbf16>, vector<32x32xf32> -> vector<32x32xf32>
    %112 = vector.broadcast %52 : vector<1x32xf32> to vector<32x32xf32>
    %113 = arith.addf %111, %112 : vector<32x32xf32>
    %114 = arith.addf %113, %80 : vector<32x32xf32>
    %cst_31 = arith.constant dense<0.000000e+00> : vector<32xf32>
    %115 = vector.multi_reduction <add>, %114, %cst_31 [1] : vector<32x32xf32> to vector<32xf32>
    %116 = vector.shape_cast %115 : vector<32xf32> to vector<32x1xf32>
    %cst_32 = arith.constant 3.200000e+01 : f32
    %117 = vector.broadcast %cst_32 : f32 to vector<32x1xf32>
    %118 = arith.divf %116, %117 : vector<32x1xf32>
    %119 = vector.broadcast %118 : vector<32x1xf32> to vector<32x32xf32>
    %120 = arith.subf %114, %119 : vector<32x32xf32>
    %121 = arith.mulf %120, %120 : vector<32x32xf32>
    %cst_33 = arith.constant dense<0.000000e+00> : vector<32xf32>
    %122 = vector.multi_reduction <add>, %121, %cst_33 [1] : vector<32x32xf32> to vector<32xf32>
    %123 = vector.shape_cast %122 : vector<32xf32> to vector<32x1xf32>
    %cst_34 = arith.constant 3.200000e+01 : f32
    %124 = vector.broadcast %cst_34 : f32 to vector<32x1xf32>
    %125 = arith.divf %123, %124 : vector<32x1xf32>
    %126 = vector.broadcast %118 : vector<32x1xf32> to vector<32x32xf32>
    %127 = arith.subf %114, %126 : vector<32x32xf32>
    %cst_35 = arith.constant 9.99999974E-6 : f32
    %128 = vector.broadcast %cst_35 : f32 to vector<32x1xf32>
    %129 = arith.addf %125, %128 : vector<32x1xf32>
    %130 = math.rsqrt %129 : vector<32x1xf32>
    %131 = vector.broadcast %130 : vector<32x1xf32> to vector<32x32xf32>
    %132 = arith.mulf %127, %131 : vector<32x32xf32>
    %133 = vector.broadcast %49 : vector<1x32xf32> to vector<32x32xf32>
    %134 = arith.mulf %132, %133 : vector<32x32xf32>
    %135 = vector.broadcast %50 : vector<1x32xf32> to vector<32x32xf32>
    %136 = arith.addf %134, %135 : vector<32x32xf32>
    %137 = arith.truncf %136 : vector<32x32xf32> to vector<32x32xbf16>
    %cst_36 = arith.constant dense<0.000000e+00> : vector<32x128xf32>
    %138 = tpu.matmul %137, %57, %cst_36 {dimension_numbers = #tpu.dot_dimension_numbers<[1], [0], [0], [1], [0, 0, 1, 1], [], []>} : vector<32x32xbf16>, vector<32x128xbf16>, vector<32x128xf32> -> vector<32x128xf32>
    %139 = vector.broadcast %53 : vector<1x128xf32> to vector<32x128xf32>
    %140 = arith.addf %138, %139 : vector<32x128xf32>
    %cst_37 = arith.constant 5.000000e-01 : f32
    %141 = vector.broadcast %cst_37 : f32 to vector<32x128xf32>
    %142 = arith.mulf %141, %140 : vector<32x128xf32>
    %cst_38 = arith.constant 0.707106769 : f32
    %143 = vector.broadcast %cst_38 : f32 to vector<32x128xf32>
    %144 = arith.mulf %140, %143 : vector<32x128xf32>
    %145 = math.erf %144 : vector<32x128xf32>
    %cst_39 = arith.constant 1.000000e+00 : f32
    %146 = vector.broadcast %cst_39 : f32 to vector<32x128xf32>
    %147 = arith.addf %146, %145 : vector<32x128xf32>
    %148 = arith.mulf %142, %147 : vector<32x128xf32>
    %149 = arith.truncf %148 : vector<32x128xf32> to vector<32x128xbf16>
    %cst_40 = arith.constant dense<0.000000e+00> : vector<32x32xf32>
    %150 = tpu.matmul %149, %58, %cst_40 {dimension_numbers = #tpu.dot_dimension_numbers<[1], [0], [0], [1], [0, 0, 1, 1], [], []>} : vector<32x128xbf16>, vector<128x32xbf16>, vector<32x32xf32> -> vector<32x32xf32>
    %151 = vector.broadcast %54 : vector<1x32xf32> to vector<32x32xf32>
    %152 = arith.addf %150, %151 : vector<32x32xf32>
    %153 = arith.addf %152, %136 : vector<32x32xf32>
    %154 = vector.extract_strided_slice %1 {offsets = [4, 0], sizes = [1, 32], strides = [1, 1]} : vector<9x128xf32> to vector<1x32xf32>
    %155 = vector.extract_strided_slice %1 {offsets = [4, 32], sizes = [1, 32], strides = [1, 1]} : vector<9x128xf32> to vector<1x32xf32>
    %156 = vector.extract_strided_slice %1 {offsets = [4, 64], sizes = [1, 32], strides = [1, 1]} : vector<9x128xf32> to vector<1x32xf32>
    %157 = vector.extract_strided_slice %1 {offsets = [4, 96], sizes = [1, 32], strides = [1, 1]} : vector<9x128xf32> to vector<1x32xf32>
    %158 = vector.extract_strided_slice %1 {offsets = [5, 0], sizes = [1, 96], strides = [1, 1]} : vector<9x128xf32> to vector<1x96xf32>
    %159 = vector.extract_strided_slice %1 {offsets = [5, 96], sizes = [1, 32], strides = [1, 1]} : vector<9x128xf32> to vector<1x32xf32>
    %160 = vector.extract_strided_slice %1 {offsets = [6, 0], sizes = [1, 128], strides = [1, 1]} : vector<9x128xf32> to vector<1x128xf32>
    %161 = vector.extract_strided_slice %1 {offsets = [7, 0], sizes = [1, 32], strides = [1, 1]} : vector<9x128xf32> to vector<1x32xf32>
    %c240 = arith.constant 240 : index
    %c0_41 = arith.constant 0 : index
    %162 = vector.load %arg2[%c240, %c0_41] : memref<496x128xbf16, #tpu.memory_space<vmem>>, vector<32x96xbf16>
    %c272 = arith.constant 272 : index
    %c0_42 = arith.constant 0 : index
    %163 = vector.load %arg2[%c272, %c0_42] : memref<496x128xbf16, #tpu.memory_space<vmem>>, vector<32x32xbf16>
    %c304 = arith.constant 304 : index
    %c0_43 = arith.constant 0 : index
    %164 = vector.load %arg2[%c304, %c0_43] : memref<496x128xbf16, #tpu.memory_space<vmem>>, vector<32x128xbf16>
    %c336 = arith.constant 336 : index
    %c0_44 = arith.constant 0 : index
    %165 = vector.load %arg2[%c336, %c0_44] : memref<496x128xbf16, #tpu.memory_space<vmem>>, vector<128x32xbf16>
    %cst_45 = arith.constant dense<0.000000e+00> : vector<32xf32>
    %166 = vector.multi_reduction <add>, %153, %cst_45 [1] : vector<32x32xf32> to vector<32xf32>
    %167 = vector.shape_cast %166 : vector<32xf32> to vector<32x1xf32>
    %cst_46 = arith.constant 3.200000e+01 : f32
    %168 = vector.broadcast %cst_46 : f32 to vector<32x1xf32>
    %169 = arith.divf %167, %168 : vector<32x1xf32>
    %170 = vector.broadcast %169 : vector<32x1xf32> to vector<32x32xf32>
    %171 = arith.subf %153, %170 : vector<32x32xf32>
    %172 = arith.mulf %171, %171 : vector<32x32xf32>
    %cst_47 = arith.constant dense<0.000000e+00> : vector<32xf32>
    %173 = vector.multi_reduction <add>, %172, %cst_47 [1] : vector<32x32xf32> to vector<32xf32>
    %174 = vector.shape_cast %173 : vector<32xf32> to vector<32x1xf32>
    %cst_48 = arith.constant 3.200000e+01 : f32
    %175 = vector.broadcast %cst_48 : f32 to vector<32x1xf32>
    %176 = arith.divf %174, %175 : vector<32x1xf32>
    %177 = vector.broadcast %169 : vector<32x1xf32> to vector<32x32xf32>
    %178 = arith.subf %153, %177 : vector<32x32xf32>
    %cst_49 = arith.constant 9.99999974E-6 : f32
    %179 = vector.broadcast %cst_49 : f32 to vector<32x1xf32>
    %180 = arith.addf %176, %179 : vector<32x1xf32>
    %181 = math.rsqrt %180 : vector<32x1xf32>
    %182 = vector.broadcast %181 : vector<32x1xf32> to vector<32x32xf32>
    %183 = arith.mulf %178, %182 : vector<32x32xf32>
    %184 = vector.broadcast %154 : vector<1x32xf32> to vector<32x32xf32>
    %185 = arith.mulf %183, %184 : vector<32x32xf32>
    %186 = vector.broadcast %155 : vector<1x32xf32> to vector<32x32xf32>
    %187 = arith.addf %185, %186 : vector<32x32xf32>
    %188 = arith.truncf %187 : vector<32x32xf32> to vector<32x32xbf16>
    %cst_50 = arith.constant dense<0.000000e+00> : vector<32x96xf32>
    %189 = tpu.matmul %188, %162, %cst_50 {dimension_numbers = #tpu.dot_dimension_numbers<[1], [0], [0], [1], [0, 0, 1, 1], [], []>} : vector<32x32xbf16>, vector<32x96xbf16>, vector<32x96xf32> -> vector<32x96xf32>
    %190 = vector.broadcast %158 : vector<1x96xf32> to vector<32x96xf32>
    %191 = arith.addf %189, %190 : vector<32x96xf32>
    %192 = vector.extract_strided_slice %191 {offsets = [0, 0], sizes = [32, 32], strides = [1, 1]} : vector<32x96xf32> to vector<32x32xf32>
    %193 = vector.extract_strided_slice %191 {offsets = [0, 32], sizes = [32, 32], strides = [1, 1]} : vector<32x96xf32> to vector<32x32xf32>
    %194 = vector.extract_strided_slice %191 {offsets = [0, 64], sizes = [32, 32], strides = [1, 1]} : vector<32x96xf32> to vector<32x32xf32>
    %195 = tpu.transpose %193, [1, 0] : vector<32x32xf32> -> vector<32x32xf32>
    %196 = tpu.concatenate %195, %195, %195, %195 in 1 : vector<32x32xf32>, vector<32x32xf32>, vector<32x32xf32>, vector<32x32xf32> -> vector<32x128xf32>
    %197 = arith.mulf %196, %36 : vector<32x128xf32>
    %198 = arith.truncf %197 : vector<32x128xf32> to vector<32x128xbf16>
    %199 = tpu.concatenate %194, %194, %194, %194 in 0 : vector<32x32xf32>, vector<32x32xf32>, vector<32x32xf32>, vector<32x32xf32> -> vector<128x32xf32>
    %200 = arith.mulf %199, %46 : vector<128x32xf32>
    %201 = tpu.concatenate %200, %46 in 1 : vector<128x32xf32>, vector<128x32xf32> -> vector<128x64xf32>
    %202 = arith.truncf %201 : vector<128x64xf32> to vector<128x64xbf16>
    %203 = arith.truncf %192 : vector<32x32xf32> to vector<32x32xbf16>
    %cst_51 = arith.constant dense<0.000000e+00> : vector<32x128xf32>
    %204 = tpu.matmul %203, %198, %cst_51 {dimension_numbers = #tpu.dot_dimension_numbers<[1], [0], [0], [1], [0, 0, 1, 1], [], []>} : vector<32x32xbf16>, vector<32x128xbf16>, vector<32x128xf32> -> vector<32x128xf32>
    %205 = arith.addf %204, %26 : vector<32x128xf32>
    %cst_52 = arith.constant dense<0xFF800000> : vector<32xf32>
    %206 = vector.multi_reduction <maximumf>, %205, %cst_52 [1] : vector<32x128xf32> to vector<32xf32>
    %207 = vector.shape_cast %206 : vector<32xf32> to vector<32x1xf32>
    %208 = vector.broadcast %207 : vector<32x1xf32> to vector<32x128xf32>
    %209 = arith.subf %205, %208 : vector<32x128xf32>
    %210 = math.exp %209 : vector<32x128xf32>
    %211 = arith.truncf %210 : vector<32x128xf32> to vector<32x128xbf16>
    %cst_53 = arith.constant dense<0.000000e+00> : vector<32x64xf32>
    %212 = tpu.matmul %211, %202, %cst_53 {dimension_numbers = #tpu.dot_dimension_numbers<[1], [0], [0], [1], [0, 0, 1, 1], [], []>} : vector<32x128xbf16>, vector<128x64xbf16>, vector<32x64xf32> -> vector<32x64xf32>
    %213 = vector.extract_strided_slice %212 {offsets = [0, 0], sizes = [32, 32], strides = [1, 1]} : vector<32x64xf32> to vector<32x32xf32>
    %214 = vector.extract_strided_slice %212 {offsets = [0, 32], sizes = [32, 32], strides = [1, 1]} : vector<32x64xf32> to vector<32x32xf32>
    %215 = tpu.reciprocal %214 {approx = true} : vector<32x32xf32> -> vector<32x32xf32>
    %216 = arith.mulf %213, %215 : vector<32x32xf32>
    %217 = arith.truncf %216 : vector<32x32xf32> to vector<32x32xbf16>
    %cst_54 = arith.constant dense<0.000000e+00> : vector<32x32xf32>
    %218 = tpu.matmul %217, %163, %cst_54 {dimension_numbers = #tpu.dot_dimension_numbers<[1], [0], [0], [1], [0, 0, 1, 1], [], []>} : vector<32x32xbf16>, vector<32x32xbf16>, vector<32x32xf32> -> vector<32x32xf32>
    %219 = vector.broadcast %159 : vector<1x32xf32> to vector<32x32xf32>
    %220 = arith.addf %218, %219 : vector<32x32xf32>
    %221 = arith.addf %220, %187 : vector<32x32xf32>
    %cst_55 = arith.constant dense<0.000000e+00> : vector<32xf32>
    %222 = vector.multi_reduction <add>, %221, %cst_55 [1] : vector<32x32xf32> to vector<32xf32>
    %223 = vector.shape_cast %222 : vector<32xf32> to vector<32x1xf32>
    %cst_56 = arith.constant 3.200000e+01 : f32
    %224 = vector.broadcast %cst_56 : f32 to vector<32x1xf32>
    %225 = arith.divf %223, %224 : vector<32x1xf32>
    %226 = vector.broadcast %225 : vector<32x1xf32> to vector<32x32xf32>
    %227 = arith.subf %221, %226 : vector<32x32xf32>
    %228 = arith.mulf %227, %227 : vector<32x32xf32>
    %cst_57 = arith.constant dense<0.000000e+00> : vector<32xf32>
    %229 = vector.multi_reduction <add>, %228, %cst_57 [1] : vector<32x32xf32> to vector<32xf32>
    %230 = vector.shape_cast %229 : vector<32xf32> to vector<32x1xf32>
    %cst_58 = arith.constant 3.200000e+01 : f32
    %231 = vector.broadcast %cst_58 : f32 to vector<32x1xf32>
    %232 = arith.divf %230, %231 : vector<32x1xf32>
    %233 = vector.broadcast %225 : vector<32x1xf32> to vector<32x32xf32>
    %234 = arith.subf %221, %233 : vector<32x32xf32>
    %cst_59 = arith.constant 9.99999974E-6 : f32
    %235 = vector.broadcast %cst_59 : f32 to vector<32x1xf32>
    %236 = arith.addf %232, %235 : vector<32x1xf32>
    %237 = math.rsqrt %236 : vector<32x1xf32>
    %238 = vector.broadcast %237 : vector<32x1xf32> to vector<32x32xf32>
    %239 = arith.mulf %234, %238 : vector<32x32xf32>
    %240 = vector.broadcast %156 : vector<1x32xf32> to vector<32x32xf32>
    %241 = arith.mulf %239, %240 : vector<32x32xf32>
    %242 = vector.broadcast %157 : vector<1x32xf32> to vector<32x32xf32>
    %243 = arith.addf %241, %242 : vector<32x32xf32>
    %244 = arith.truncf %243 : vector<32x32xf32> to vector<32x32xbf16>
    %cst_60 = arith.constant dense<0.000000e+00> : vector<32x128xf32>
    %245 = tpu.matmul %244, %164, %cst_60 {dimension_numbers = #tpu.dot_dimension_numbers<[1], [0], [0], [1], [0, 0, 1, 1], [], []>} : vector<32x32xbf16>, vector<32x128xbf16>, vector<32x128xf32> -> vector<32x128xf32>
    %246 = vector.broadcast %160 : vector<1x128xf32> to vector<32x128xf32>
    %247 = arith.addf %245, %246 : vector<32x128xf32>
    %cst_61 = arith.constant 5.000000e-01 : f32
    %248 = vector.broadcast %cst_61 : f32 to vector<32x128xf32>
    %249 = arith.mulf %248, %247 : vector<32x128xf32>
    %cst_62 = arith.constant 0.707106769 : f32
    %250 = vector.broadcast %cst_62 : f32 to vector<32x128xf32>
    %251 = arith.mulf %247, %250 : vector<32x128xf32>
    %252 = math.erf %251 : vector<32x128xf32>
    %cst_63 = arith.constant 1.000000e+00 : f32
    %253 = vector.broadcast %cst_63 : f32 to vector<32x128xf32>
    %254 = arith.addf %253, %252 : vector<32x128xf32>
    %255 = arith.mulf %249, %254 : vector<32x128xf32>
    %256 = arith.truncf %255 : vector<32x128xf32> to vector<32x128xbf16>
    %cst_64 = arith.constant dense<0.000000e+00> : vector<32x32xf32>
    %257 = tpu.matmul %256, %165, %cst_64 {dimension_numbers = #tpu.dot_dimension_numbers<[1], [0], [0], [1], [0, 0, 1, 1], [], []>} : vector<32x128xbf16>, vector<128x32xbf16>, vector<32x32xf32> -> vector<32x32xf32>
    %258 = vector.broadcast %161 : vector<1x32xf32> to vector<32x32xf32>
    %259 = arith.addf %257, %258 : vector<32x32xf32>
    %260 = arith.addf %259, %243 : vector<32x32xf32>
    %261 = vector.extract_strided_slice %1 {offsets = [8, 0], sizes = [1, 32], strides = [1, 1]} : vector<9x128xf32> to vector<1x32xf32>
    %262 = vector.extract_strided_slice %1 {offsets = [8, 32], sizes = [1, 32], strides = [1, 1]} : vector<9x128xf32> to vector<1x32xf32>
    %cst_65 = arith.constant dense<0.000000e+00> : vector<32xf32>
    %263 = vector.multi_reduction <add>, %260, %cst_65 [1] : vector<32x32xf32> to vector<32xf32>
    %264 = vector.shape_cast %263 : vector<32xf32> to vector<32x1xf32>
    %cst_66 = arith.constant 3.200000e+01 : f32
    %265 = vector.broadcast %cst_66 : f32 to vector<32x1xf32>
    %266 = arith.divf %264, %265 : vector<32x1xf32>
    %267 = vector.broadcast %266 : vector<32x1xf32> to vector<32x32xf32>
    %268 = arith.subf %260, %267 : vector<32x32xf32>
    %269 = arith.mulf %268, %268 : vector<32x32xf32>
    %cst_67 = arith.constant dense<0.000000e+00> : vector<32xf32>
    %270 = vector.multi_reduction <add>, %269, %cst_67 [1] : vector<32x32xf32> to vector<32xf32>
    %271 = vector.shape_cast %270 : vector<32xf32> to vector<32x1xf32>
    %cst_68 = arith.constant 3.200000e+01 : f32
    %272 = vector.broadcast %cst_68 : f32 to vector<32x1xf32>
    %273 = arith.divf %271, %272 : vector<32x1xf32>
    %274 = vector.broadcast %266 : vector<32x1xf32> to vector<32x32xf32>
    %275 = arith.subf %260, %274 : vector<32x32xf32>
    %cst_69 = arith.constant 9.99999974E-6 : f32
    %276 = vector.broadcast %cst_69 : f32 to vector<32x1xf32>
    %277 = arith.addf %273, %276 : vector<32x1xf32>
    %278 = math.rsqrt %277 : vector<32x1xf32>
    %279 = vector.broadcast %278 : vector<32x1xf32> to vector<32x32xf32>
    %280 = arith.mulf %275, %279 : vector<32x32xf32>
    %281 = vector.broadcast %261 : vector<1x32xf32> to vector<32x32xf32>
    %282 = arith.mulf %280, %281 : vector<32x32xf32>
    %283 = vector.broadcast %262 : vector<1x32xf32> to vector<32x32xf32>
    %284 = arith.addf %282, %283 : vector<32x32xf32>
    %c464 = arith.constant 464 : index
    %c0_70 = arith.constant 0 : index
    %285 = vector.load %arg2[%c464, %c0_70] : memref<496x128xbf16, #tpu.memory_space<vmem>>, vector<32x128xbf16>
    %286 = arith.truncf %284 : vector<32x32xf32> to vector<32x32xbf16>
    %cst_71 = arith.constant dense<0.000000e+00> : vector<32x128xf32>
    %287 = tpu.matmul %286, %285, %cst_71 {dimension_numbers = #tpu.dot_dimension_numbers<[1], [0], [0], [1], [0, 0, 1, 1], [], []>} : vector<32x32xbf16>, vector<32x128xbf16>, vector<32x128xf32> -> vector<32x128xf32>
    %c0_72 = arith.constant 0 : index
    %c0_73 = arith.constant 0 : index
    %288 = vector.load %arg3[%c0_72, %c0_73] : memref<32x128xf32, #tpu.memory_space<vmem>>, vector<32x128xf32>
    tpu.vector_store %arg3[%c0_72, %c0_73], %287 {strides = array<i32>} : memref<32x128xf32, #tpu.memory_space<vmem>>, vector<32x128xf32>,
    return
  }
}

</mosaic_0001>

<bundles_post_ra>
// kernel: imagegpt_forward.1
= control target key start
LH: loop header
LB: loop body
LE: loop exit
PB: predicated region body
PF: predicated region fallthrough
CT: control target
= control target key end

     0   :  { %8 = vsyncpa [#allocation3], 0  ;;  %s3727_s0 = inlined_call_operand.vmem [shape: s32[32,1], index: 0, kind: input, shape index: {}]   ;;  %s3728_s1 = inlined_call_operand.hbm [shape: f32[41,128], index: 1, kind: input, shape index: {}]   ;;  %s3729_s2 = inlined_call_operand.hbm [shape: bf16[496,128], index: 2, kind: input, shape index: {}]   ;;  %s3730_s3 = inlined_call_operand.hbm [shape: f32[32,128], index: 3, kind: output, shape index: {}]  }
   0x1   :  { %9 = vsyncpa [#allocation6], 0 }
   0x2   :  { %10 = vsyncpa [#allocation4], 0  ;;  %s2920_s12 = smov [#allocation2]  }
   0x3   :  { %s18_s13 = sshll.u32 %s2920_s12, 4  ;;  %s19_s13 = int_to_ptr.vmem [resolvable:$true] %s18_s13 }
   0x4   :  { %s2862_s14 = scalar_lea.vmem %s19_s13, 768  ;;  %p2867_p1 = scmp.lt.s32.totalorder %s19_s13, %s19_s13 }
   0x5   :  { %p2863_p0 = scmp.ne.s32.totalorder %s19_s13, %s2862_s14  ;;  %p2868_p2 = scmp.lt.s32.totalorder %s2862_s14, %s2862_s14 }
   0x7   :  { %p2869_p3 = por %p2868_p2, %p2867_p1 }
   0x9   :  { %p2870_p4 = pnand %p2869_p3, %p2863_p0 }
   0xb   :  { %2873 = shalt.err (!%p2870_p4)
}
   0xc   :  { %s2921_s15 = smov 128   ;;  %s2922_s16 = smov 8  }
   0xd   :  { %24 = dma.hbm_to_vmem [thread:$0]  %s3728_s1, 768, %s19_s13, [#allocation3], %s2921_s15, %s2921_s15, %s2922_s16  }
   0xe   :  { %s2923_s19 = smov [#allocation5]  }
   0xf   :  { %s30_s20 = sshll.u32 %s2923_s19, 4  ;;  %s31_s20 = int_to_ptr.vmem [resolvable:$true] %s30_s20 }
  0x10   :  { %s2882_s21 = scalar_lea.vmem %s31_s20, 3968  ;;  %p2887_p6 = scmp.lt.s32.totalorder %s31_s20, %s31_s20 }
  0x11   :  { %p2883_p5 = scmp.ne.s32.totalorder %s31_s20, %s2882_s21  ;;  %p2888_p7 = scmp.lt.s32.totalorder %s2882_s21, %s2882_s21 }
  0x13   :  { %p2889_p8 = por %p2888_p7, %p2887_p6 }
  0x15   :  { %p2890_p9 = pnand %p2889_p8, %p2883_p5 }
  0x17   :  { %2893 = shalt.err (!%p2890_p9)
}
  0x18   :  { %s2924_s22 = smov 64   ;;  %s2925_s23 = smov 4  }
  0x19   :  { %36 = dma.hbm_to_vmem [thread:$0]  %s3729_s2, 3968, %s31_s20, [#allocation6], %s2924_s22, %s2924_s22, %s2925_s23  }
  0x1a   :  { %2914 = dma.done.wait [#allocation3], 768  }
  0x1b   :  { %2915 = vsyncadd [#allocation3], 4294966528 }
  0x1c   :  { %2916 = dma.done.wait [#allocation6], 3968  }
  0x1d   :  { %2917 = vsyncadd [#allocation6], 4294963328  ;;  %v2926_v0 = vmov 0   ;;  %v54_v1 = vld [vmem:[%s3727_s0 + $0x10] sm:$0xff]  ;;  %v52_v2 = vld [vmem:[%s3727_s0] sm:$0xff]  ;;  %v56_v6 = vlaneseq  ;;  %vm86_vm4 = vcmask 130048  }
  0x1e   :  { %2572 = vset.pattern.permute.xlu1 %v2926_v0  ;;  %2571 = vset.pattern.permute.xlu0 %v2926_v0  ;;  %v55_v3 = vld [vmem:[%s3727_s0 + $0x18] sm:$0xff]  ;;  %v53_v4 = vld [vmem:[%s3727_s0 + $0x8] sm:$0xff]  ;;  %v2733_v5 = vld [vmem:[#allocation5] sm:$0xff]   ;;  %v2927_v12 = vmov 0.0   ;;  %vm271_vm5 = vcmask 261120   ;;  %s2928_s0 = smov 96  }
  0x1f   :  { %65 = vperm.xlu1 %2572, %v54_v1   ;;  %59 = vperm.xlu0 %2571, %v52_v2   ;;  %v2976_v7 = vand.u32 127, %v56_v6  ;;  %v44_v20 = vld [vmem:[#allocation2] sm:$0xff]  ;;  %v46_v21 = vld [vmem:[#allocation2 + $0x10] sm:$0xff]  ;;  %v45_v25 = vld [vmem:[#allocation2 + $0x8] sm:$0xff]  ;;  %v2995_v55 = vshrl.u32 %v56_v6, 7  ;;  %s2929_s5 = smov 32  }
  0x20   :  { %2401 = vmatprep.subr.bf16.mxu1 %v2733_v5  ;;  %v47_v28 = vld [vmem:[#allocation2 + $0x18] sm:$0xff]  ;;  %v48_v57 = vld [vmem:[#allocation2 + $0x20] sm:$0xff]  ;;  %s2931_s6 = smov [#allocation7]  }
  0x21   :  { %2402 = vmatpush3.bf16.msra.mxu1 %v2733_v5  ;;  %v327_v56 = vsub.s32 0, %v2995_v55  ;;  %v2734_v59 = vld [vmem:[#allocation5 + $0x10] sm:$0xff]   ;;  %v2735_v60 = vld [vmem:[#allocation5 + $0x8] sm:$0xff]   ;;  %s2257_s7 = sshll.u32 %s2931_s6, 4  ;;  %s2258_s7 = int_to_ptr.vmem [resolvable:$true] %s2257_s7 }
  0x22   :  { %2407 = vmatprep.subr.bf16.mxu1 %v2734_v59  ;;  %s2894_s8 = scalar_lea.vmem %s2258_s7, 512  ;;  %p2899_p11 = scmp.lt.s32.totalorder %s2258_s7, %s2258_s7 }
  0x23   :  { %68 = vperm.xlu1 %2572, %v55_v3   ;;  %62 = vperm.xlu0 %2571, %v53_v4   ;;  %v2998_v58 = vrot.slane %v48_v57, %v327_v56  ;;  %p2895_p10 = scmp.ne.s32.totalorder %s2258_s7, %s2894_s8  ;;  %p2900_p12 = scmp.lt.s32.totalorder %s2894_s8, %s2894_s8 }
  0x25   :  { %p2901_p13 = por %p2900_p12, %p2899_p11 }
  0x27   :  { %p2902_p0 = pnand %p2901_p13, %p2895_p10 }
  0x9a   :  { %v66_v8 = vpop.permute.xlu1 %65  ;;  %v60_v9 = vpop.permute.xlu0 %59 }
  0x9b   :  { %vm72_vm0 = vcmp.eq.s32.totalorder %v2976_v7, %v66_v8  ;;  %vm70_vm1 = vcmp.eq.s32.totalorder %v2976_v7, %v60_v9 }
  0x9c   :  { %v76_v13 = vsel %vm72_vm0, 1.0, %v2927_v12  ;;  %v74_v15 = vsel %vm70_vm1, 1.0, %v2927_v12 }
  0x9e   :  { %v69_v10 = vpop.permute.xlu1 %68  ;;  %v63_v11 = vpop.permute.xlu0 %62 }
  0x9f   :  { %vm73_vm2 = vcmp.eq.s32.totalorder %v2976_v7, %v69_v10  ;;  %vm71_vm3 = vcmp.eq.s32.totalorder %v2976_v7, %v63_v11 }
  0xa0   :  { %v77_v14 = vsel %vm73_vm2, 1.0, %v2927_v12  ;;  %v75_v16 = vsel %vm71_vm3, 1.0, %v2927_v12 }
  0xa1   :  { %v79_v17 = vpack.c.bf16 %v77_v14, %v76_v13  ;;  %v78_v18 = vpack.c.bf16 %v75_v16, %v74_v15 }
  0xa3   :  { %2403 = vmatprep.mubr.msk.bf16.mxu1 %vm86_vm4, %v78_v18 }
  0xa4   :  { %2404 = vmatmul.mubr.msk.bf16.vlgmr.msra.gmra.mxu1 %vm86_vm4, %v79_v17 }
  0xa5   :  { %2408 = vmatpush3.bf16.msra.mxu1 %v2734_v59  ;;  %v188_v59 = vadd.s32 80, %v2995_v55 }
  0xa6   :  { %2409 = vmatprep.subr.bf16.mxu1 %v2735_v60 }
  0xa9   :  { %2410 = vmatpush3.bf16.msra.mxu1 %v2735_v60  ;;  %v189_v60 = vadd.s32 88, %v2995_v55 }
 0x164   :  { %v2405_v19 = vpop.f32.mrf.mxu1 }
 0x165   :  { %v136_v26 = vadd.f32 %v2405_v19, %v46_v21 }
 0x166   :  { %v127_v22 = vpop.f32.mrf.mxu1 }
 0x167   :  { %v128_v23 = vadd.f32 %v127_v22, %v44_v20  ;;  %v278_v33 = vsel %vm271_vm5, %v136_v26, 0.0 }
 0x168   :  { %v2406_v24 = vpop.f32.mrf.mxu1 }
 0x169   :  { %v272_v27 = vsel %vm271_vm5, %v128_v23, 0.0  ;;  %v139_v31 = vadd.f32 %v2406_v24, %v47_v28 }
 0x16a   :  { %v130_v29 = vpop.f32.mrf.mxu1  ;;  %273 = vadd.xlane.f32.xlu0 %v272_v27 }
 0x16b   :  { %v131_v30 = vadd.f32 %v130_v29, %v45_v25  ;;  %v281_v34 = vsel %vm271_vm5, %v139_v31, 0.0 }
 0x16d   :  { %v275_v32 = vsel %vm271_vm5, %v131_v30, 0.0 }
 0x16e   :  { %276 = vadd.xlane.f32.xlu1 %v275_v32  ;;  %279 = vadd.xlane.f32.xlu0 %v278_v33 }
 0x172   :  { %282 = vadd.xlane.f32.xlu0 %v281_v34 }
 0x1f3   :  { %v274_v35 = vpop.xlane.xlu0 %273 }
 0x1f4   :  { %v285_v36 = vmul.f32 0.03125, %v274_v35 }
 0x1f6   :  { %v289_v41 = vsub.f32 %v128_v23, %v285_v36 }
 0x1f7   :  { %v277_v37 = vpop.xlane.xlu1 %276  ;;  %v280_v38 = vpop.xlane.xlu0 %279 }
 0x1f8   :  { %v286_v39 = vmul.f32 0.03125, %v277_v37  ;;  %v287_v40 = vmul.f32 0.03125, %v280_v38  ;;  %v293_v51 = vmul.f32 %v289_v41, %v289_v41 }
 0x1fa   :  { %v290_v42 = vsub.f32 %v131_v30, %v286_v39  ;;  %v291_v43 = vsub.f32 %v136_v26, %v287_v40  ;;  %v297_v53 = vsel %vm271_vm5, %v293_v51, 0.0  ;;  %v345_v30 = vsub.s32 1, %v2995_v55 }
 0x1fb   :  { %v283_v44 = vpop.xlane.xlu0 %282 }
 0x1fc   :  { %v288_v45 = vmul.f32 0.03125, %v283_v44  ;;  %v294_v46 = vmul.f32 %v290_v42, %v290_v42  ;;  %v295_v47 = vmul.f32 %v291_v43, %v291_v43  ;;  %v3021_v32 = vrot.slane %v48_v57, %v345_v30 }
 0x1fd   :  { %v3099_v30 = vadd.s32 24, %v2995_v55 }
 0x1fe   :  { %v292_v48 = vsub.f32 %v139_v31, %v288_v45  ;;  %v300_v49 = vsel %vm271_vm5, %v294_v46, 0.0  ;;  %v303_v50 = vsel %vm271_vm5, %v295_v47, 0.0  ;;  %v190_v45 = vadd.s32 96, %v2995_v55 }
 0x1ff   :  { %301 = vadd.xlane.f32.xlu0 %v300_v49  ;;  %304 = vadd.xlane.f32.xlu1 %v303_v50  ;;  %v191_v46 = vadd.s32 104, %v2995_v55  ;;  %v3049_v47 = vshra.s32 %v2976_v7, 3 }
 0x200   :  { %v296_v52 = vmul.f32 %v292_v48, %v292_v48 }
 0x201   :  { %v207_v49 = vshra.s32 %v191_v46, 5 }
 0x202   :  { %v306_v54 = vsel %vm271_vm5, %v296_v52, 0.0 }
 0x203   :  { %298 = vadd.xlane.f32.xlu1 %v297_v53  ;;  %307 = vadd.xlane.f32.xlu0 %v306_v54  ;;  %vm224_vm7 = vcmp.eq.s32.totalorder %v207_v49, %v3049_v47  ;;  %v192_v53 = vadd.s32 112, %v2995_v55  ;;  %v193_v54 = vadd.s32 120, %v2995_v55 }
 0x204   :  { %v240_v51 = vsel %vm224_vm7, 1.0, %v2927_v12 }
 0x205   :  { %v208_v56 = vshra.s32 %v192_v53, 5  ;;  %v209_v57 = vshra.s32 %v193_v54, 5 }
 0x207   :  { %vm225_vm8 = vcmp.eq.s32.totalorder %v208_v56, %v3049_v47  ;;  %vm226_vm9 = vcmp.eq.s32.totalorder %v209_v57, %v3049_v47 }
 0x214   :  { %334 = vrot.lane.b32.xlu1 %v2998_v58, %s2928_s0 }
 0x288   :  { %v305_v61 = vpop.xlane.xlu1 %304  ;;  %v302_v62 = vpop.xlane.xlu0 %301 }
 0x289   :  { %v311_v63 = vmul.f32 0.03125, %v305_v61  ;;  %v310_v0 = vmul.f32 0.03125, %v302_v62  ;;  %v241_v61 = vsel %vm225_vm8, 1.0, %v2927_v12  ;;  %v242_v62 = vsel %vm226_vm9, 1.0, %v2927_v12 }
 0x28a   :  { %vm506_vm9 = vcmask 523264  }
 0x28b   :  { %v315_v1 = vadd.f32 1e-05, %v311_v63  ;;  %v314_v2 = vadd.f32 1e-05, %v310_v0  ;;  %v3064_v63 = vpack.i.bf16 %v242_v62, %v241_v61  ;;  %v204_v0 = vshra.s32 %v188_v59, 5 }
 0x28c   :  { %v299_v3 = vpop.xlane.xlu1 %298  ;;  %v308_v4 = vpop.xlane.xlu0 %307 }
 0x28d   :  { %2764 = vrsqrt.f32 %v315_v1  ;;  %v309_v5 = vmul.f32 0.03125, %v299_v3  ;;  %v312_v6 = vmul.f32 0.03125, %v308_v4  ;;  %v205_v1 = vshra.s32 %v189_v60, 5 }
 0x28e   :  { %2766 = vrsqrt.f32 %v314_v2  ;;  %vm221_vm10 = vcmp.eq.s32.totalorder %v204_v0, %v3049_v47  ;;  %v186_v2 = vadd.s32 64, %v2995_v55  ;;  %v187_v3 = vadd.s32 72, %v2995_v55 }
 0x28f   :  { %v313_v8 = vadd.f32 1e-05, %v309_v5  ;;  %v316_v9 = vadd.f32 1e-05, %v312_v6  ;;  %vm222_vm11 = vcmp.eq.s32.totalorder %v205_v1, %v3049_v47  ;;  %v237_v4 = vsel %vm221_vm10, 1.0, %v2927_v12 }
 0x290   :  { %v335_v20 = vpop.permute.xlu1 %334  ;;  %v238_v5 = vsel %vm222_vm11, 1.0, %v2927_v12  ;;  %vm511_vm10 = vcmask 785408  }
 0x291   :  { %2768 = vrsqrt.f32 %v313_v8  ;;  %v3074_v6 = vpack.i.bf16 %v238_v5, %v237_v4  ;;  %v202_v8 = vshra.s32 %v186_v2, 5  ;;  %v172_v2 = vshra.s32 %v3099_v30, 3 }
 0x292   :  { %2770 = vrsqrt.f32 %v316_v9  ;;  %v203_v9 = vshra.s32 %v187_v3, 5  ;;  %v173_v3 = vshra.s32 %v2976_v7, 5  ;;  %v169_v4 = vshra.s32 %v2995_v55, 3 }
 0x293   :  { %vm219_vm12 = vcmp.eq.s32.totalorder %v202_v8, %v3049_v47 }
 0x294   :  { %vm220_vm13 = vcmp.eq.s32.totalorder %v203_v9, %v3049_v47  ;;  %vm177_vm8 = vcmp.eq.s32.totalorder %v172_v2, %v173_v3  ;;  %vm174_vm11 = vcmp.eq.s32.totalorder %v169_v4, %v173_v3 }
 0x29a   :  { %v2765_v10 = vpop.eup %2764 }
 0x29b   :  { %v2767_v11 = vpop.eup %2766  ;;  %v323_v13 = vmul.f32 %v2765_v10, %v291_v43  ;;  %v184_v10 = vadd.s32 48, %v2995_v55 }
 0x29c   :  { %v322_v14 = vmul.f32 %v2767_v11, %v290_v42  ;;  %v185_v11 = vadd.s32 56, %v2995_v55 }
 0x29d   :  { %v331_v19 = vmul.f32 %v2998_v58, %v323_v13  ;;  %v235_v13 = vsel %vm219_vm12, 1.0, %v2927_v12 }
 0x29e   :  { %v2769_v15 = vpop.eup %2768  ;;  %v330_v18 = vmul.f32 %v2998_v58, %v322_v14  ;;  %v236_v14 = vsel %vm220_vm13, 1.0, %v2927_v12 }
 0x29f   :  { %v2771_v16 = vpop.eup %2770  ;;  %v321_v17 = vmul.f32 %v2769_v15, %v289_v41  ;;  %v3010_v26 = vadd.f32 %v335_v20, %v331_v19  ;;  %v3083_v15 = vpack.i.bf16 %v236_v14, %v235_v13  ;;  %v183_v19 = vadd.s32 40, %v2995_v55 }
 0x2a0   :  { %v324_v21 = vmul.f32 %v2771_v16, %v292_v48  ;;  %v3008_v25 = vadd.f32 %v335_v20, %v330_v18  ;;  %v206_v48 = vshra.s32 %v190_v45, 5  ;;  %v200_v16 = vshra.s32 %v184_v10, 5 }
 0x2a1   :  { %v329_v22 = vmul.f32 %v2998_v58, %v321_v17  ;;  %v201_v17 = vshra.s32 %v185_v11, 5  ;;  %v182_v18 = vadd.s32 32, %v2995_v55  ;;  %v194_v45 = vshra.s32 %v2995_v55, 5 }
 0x2a2   :  { %v332_v23 = vmul.f32 %v2998_v58, %v324_v21  ;;  %vm223_vm6 = vcmp.eq.s32.totalorder %v206_v48, %v3049_v47  ;;  %vm217_vm14 = vcmp.eq.s32.totalorder %v200_v16, %v3049_v47  ;;  %v3163_v16 = vsel %vm177_vm8, 1.0, %v2927_v12 }
 0x2a3   :  { %v3006_v24 = vadd.f32 %v335_v20, %v329_v22  ;;  %v239_v50 = vsel %vm223_vm6, 1.0, %v2927_v12  ;;  %vm218_vm15 = vcmp.eq.s32.totalorder %v201_v17, %v3049_v47  ;;  %vm211_vm4 = vcmp.eq.s32.totalorder %v194_v45, %v3049_v47 }
 0x2a4   :  { %v3012_v27 = vadd.f32 %v335_v20, %v332_v23  ;;  %v2578_v52 = vpack.i.bf16 %v240_v51, %v239_v50  ;;  %v233_v20 = vsel %vm217_vm14, 1.0, %v2927_v12  ;;  %v234_v21 = vsel %vm218_vm15, 1.0, %v2927_v12 }
 0x2a5   :  { %v341_v28 = vpack.c.bf16 %v3008_v25, %v3006_v24  ;;  %v3091_v22 = vpack.i.bf16 %v234_v21, %v233_v20  ;;  %v198_v23 = vshra.s32 %v182_v18, 5  ;;  %v227_v48 = vsel %vm211_vm4, 1.0, %v2927_v12 }
 0x2a6   :  { %v342_v29 = vpack.c.bf16 %v3012_v27, %v3010_v26 }
 0x2a7   :  { %2411 = vmatprep.mubr.msk.bf16.mxu1 %vm271_vm5, %v341_v28  ;;  %v199_v28 = vshra.s32 %v183_v19, 5  ;;  %vm215_vm0 = vcmp.eq.s32.totalorder %v198_v23, %v3049_v47 }
 0x2a8   :  { %2412 = vmatmul.mubr.msk.bf16.vlgmr.msra.gmra.mxu1 %vm271_vm5, %v342_v29  ;;  %v3096_v29 = vadd.s32 16, %v2995_v55 }
 0x2a9   :  { %vm216_vm1 = vcmp.eq.s32.totalorder %v199_v28, %v3049_v47 }
 0x2aa   :  { %v171_v0 = vshra.s32 %v3096_v29, 3 }
 0x2ac   :  { %vm176_vm7 = vcmp.eq.s32.totalorder %v171_v0, %v173_v3 }
 0x2ad   :  { %v3158_v11 = vsel %vm176_vm7, 1.0, %v2927_v12 }
 0x368   :  { %v2413_v31 = vpop.f32.mrf.mxu1 }
 0x369   :  { %v3041_v40 = vadd.f32 %v2413_v31, %v3021_v32  ;;  %v231_v31 = vsel %vm215_vm0, 1.0, %v2927_v12 }
 0x36a   :  { %v399_v33 = vpop.f32.mrf.mxu1 }
 0x36b   :  { %v3024_v34 = vadd.f32 %v399_v33, %v3021_v32  ;;  %v232_v33 = vsel %vm216_vm1, 1.0, %v2927_v12 }
 0x36c   :  { %v2414_v35 = vpop.f32.mrf.mxu1 }
 0x36d   :  { %418 = vrot.lane.b32.xlu0 %v3024_v34, %s2928_s0  ;;  %v3029_v37 = vadd.f32 %v2414_v35, %v3021_v32  ;;  %v3103_v35 = vpack.i.bf16 %v232_v33, %v231_v31  ;;  %v3172_v31 = vsel %vm174_vm11, 1.0, %v2927_v12 }
 0x36e   :  { %v402_v36 = vpop.f32.mrf.mxu1 }
 0x36f   :  { %v3032_v38 = vadd.f32 %v402_v36, %v3021_v32  ;;  %v196_v36 = vshra.s32 %v3096_v29, 5 }
 0x371   :  { %420 = vrot.lane.b32.xlu1 %v3032_v38, %s2928_s0  ;;  %424 = vrot.lane.b32.xlu0 %v3029_v37, %s2928_s0  ;;  %v738_v39 = vpack.c.bf16 %v3032_v38, %v3024_v34  ;;  %vm213_vm2 = vcmp.eq.s32.totalorder %v196_v36, %v3049_v47 }
 0x373   :  { %2419 = vmatprep.mubr.msk.bf16.mxu0 %vm271_vm5, %v738_v39  ;;  %v197_v39 = vshra.s32 %v3099_v30, 5 }
 0x375   :  { %422 = vrot.lane.b32.xlu1 %v3041_v40, %s2928_s0  ;;  %vm214_vm3 = vcmp.eq.s32.totalorder %v197_v39, %v3049_v47 }
 0x3df   :  { %v419_v41 = vpop.permute.xlu0 %418 }
 0x3e0   :  { %430 = vxpose.xlu1.b32.start [1/4] (short) (narrow) %v419_v41, 32  ;;  %v3110_v41 = vadd.s32 8, %v2995_v55 }
 0x3e2   :  { %v195_v46 = vshra.s32 %v3110_v41, 5  ;;  %v170_v8 = vshra.s32 %v3110_v41, 3 }
 0x3e3   :  { %v421_v42 = vpop.permute.xlu1 %420  ;;  %v425_v44 = vpop.permute.xlu0 %424 }
 0x3e4   :  { %431 = vxpose.xlu1.b32.cont [2/4] (short) (narrow) %v421_v42, 32  ;;  %v229_v42 = vsel %vm213_vm2, 1.0, %v2927_v12  ;;  %vm212_vm6 = vcmp.eq.s32.totalorder %v195_v46, %v3049_v47  ;;  %vm175_vm12 = vcmp.eq.s32.totalorder %v170_v8, %v173_v3 }
 0x3e5   :  { %v228_v49 = vsel %vm212_vm6, 1.0, %v2927_v12  ;;  %v3177_v39 = vsel %vm175_vm12, 1.0, %v2927_v12 }
 0x3e6   :  { %v3122_v50 = vpack.i.bf16 %v228_v49, %v227_v48 }
 0x3e7   :  { %v423_v43 = vpop.permute.xlu1 %422 }
 0x3e8   :  { %432 = vxpose.xlu1.b32.cont [3/4] (short) (narrow) %v423_v43, 32  ;;  %v230_v43 = vsel %vm214_vm3, 1.0, %v2927_v12 }
 0x3ec   :  { %433 = vxpose.xlu1.b32.end [4/4] (short) (narrow) %v425_v44, 32  ;;  %v3114_v44 = vpack.i.bf16 %v230_v43, %v229_v42 }
 0x40a   :  { %2579 = vrot.lane.b32.xlu1 %v2578_v52, %s2924_s22 }
 0x40e   :  { %2619 = vrot.lane.b32.xlu1 %v3064_v63, %s2929_s5 }
 0x412   :  { %2629 = vrot.lane.b32.xlu1 %v2578_v52, %s2929_s5 }
 0x45c   :  { %v446_v51 = vpop.trf.xlu1 }
 0x45d   :  { %466 = vrot.lane.b32.xlu0 %v446_v51, %s2929_s5 }
 0x460   :  { %v447_v52 = vpop.trf.xlu1 }
 0x461   :  { %478 = vrot.lane.b32.xlu0 %v446_v51, %s2924_s22 }
 0x464   :  { %v448_v53 = vpop.trf.xlu1 }
 0x465   :  { %490 = vrot.lane.b32.xlu0 %v446_v51, %s2928_s0 }
 0x468   :  { %v449_v47 = vpop.trf.xlu1 }
 0x469   :  { %468 = vrot.lane.b32.xlu0 %v447_v52, %s2929_s5 }
 0x46d   :  { %480 = vrot.lane.b32.xlu0 %v447_v52, %s2924_s22 }
 0x471   :  { %470 = vrot.lane.b32.xlu0 %v448_v53, %s2929_s5 }
 0x475   :  { %482 = vrot.lane.b32.xlu0 %v448_v53, %s2924_s22 }
 0x479   :  { %494 = vrot.lane.b32.xlu0 %v448_v53, %s2928_s0 }
 0x47c   :  { %v3180_v46 = vpop.permute.xlu1 %2579 }
 0x47d   :  { %472 = vrot.lane.b32.xlu0 %v449_v47, %s2929_s5 }
 0x481   :  { %484 = vrot.lane.b32.xlu0 %v449_v47, %s2924_s22 }
 0x485   :  { %496 = vrot.lane.b32.xlu0 %v449_v47, %s2928_s0 }
 0x489   :  { %492 = vrot.lane.b32.xlu0 %v447_v52, %s2928_s0 }
 0x48d   :  { %2574 = vrot.lane.b32.xlu0 %v3064_v63, %s2924_s22 }
 0x491   :  { %2584 = vrot.lane.b32.xlu0 %v3074_v6, %s2924_s22 }
 0x495   :  { %2589 = vrot.lane.b32.xlu0 %v3083_v15, %s2924_s22 }
 0x499   :  { %2594 = vrot.lane.b32.xlu0 %v3091_v22, %s2924_s22 }
 0x49d   :  { %2599 = vrot.lane.b32.xlu0 %v3103_v35, %s2924_s22 }
 0x4a1   :  { %2604 = vrot.lane.b32.xlu0 %v3114_v44, %s2924_s22 }
 0x4a5   :  { %2609 = vrot.lane.b32.xlu0 %v3122_v50, %s2924_s22 }
 0x4cf   :  { %v467_v54 = vpop.permute.xlu0 %466 }
 0x4d0   :  { %v502_v19 = vsel %vm271_vm5, %v446_v51, %v467_v54 }
 0x4d3   :  { %v479_v56 = vpop.permute.xlu0 %478 }
 0x4d4   :  { %v507_v21 = vsel %vm506_vm9, %v502_v19, %v479_v56 }
 0x4d7   :  { %v491_v57 = vpop.permute.xlu0 %490 }
 0x4d8   :  { %v512_v33 = vsel %vm511_vm10, %v507_v21, %v491_v57 }
 0x4d9   :  { %v516_v49 = vmul.f32 %v512_v33, %v3172_v31 }
 0x4db   :  { %v469_v59 = vpop.permute.xlu0 %468 }
 0x4dc   :  { %v503_v36 = vsel %vm271_vm5, %v447_v52, %v469_v59 }
 0x4df   :  { %v481_v60 = vpop.permute.xlu0 %480 }
 0x4e0   :  { %v508_v42 = vsel %vm506_vm9, %v503_v36, %v481_v60 }
 0x4e3   :  { %v471_v61 = vpop.permute.xlu0 %470 }
 0x4e4   :  { %v504_v9 = vsel %vm271_vm5, %v448_v53, %v471_v61  ;;  %v2581_v53 = vunpack.i.l.bf16 %v3180_v46  ;;  %v739_v61 = vpack.c.bf16 %v3029_v37, %v3041_v40 }
 0x4e7   :  { %v483_v62 = vpop.permute.xlu0 %482 }
 0x4e8   :  { %v509_v10 = vsel %vm506_vm9, %v504_v9, %v483_v62  ;;  %v598_v62 = vmul.f32 %v2581_v53, %v3024_v34 }
 0x4eb   :  { %v495_v63 = vpop.permute.xlu0 %494 }
 0x4ec   :  { %v514_v13 = vsel %vm511_vm10, %v509_v10, %v495_v63 }
 0x4ed   :  { %v518_v23 = vmul.f32 %v514_v13, %v3158_v11 }
 0x4ef   :  { %v473_v1 = vpop.permute.xlu0 %472 }
 0x4f0   :  { %v505_v14 = vsel %vm271_vm5, %v449_v47, %v473_v1  ;;  %v3751_v47 = vunpack.i.h.bf16 %v3180_v46 }
 0x4f2   :  { %v599_v2 = vmul.f32 %v3751_v47, %v3032_v38 }
 0x4f3   :  { %v485_v5 = vpop.permute.xlu0 %484 }
 0x4f4   :  { %v510_v17 = vsel %vm506_vm9, %v505_v14, %v485_v5  ;;  %v2623_v13 = vpack.i.bf16 %v599_v2, %v598_v62 }
 0x4f7   :  { %v497_v18 = vpop.permute.xlu0 %496 }
 0x4f8   :  { %v515_v20 = vsel %vm511_vm10, %v510_v17, %v497_v18 }
 0x4f9   :  { %v519_v28 = vmul.f32 %v515_v20, %v3163_v16 }
 0x4fb   :  { %v493_v43 = vpop.permute.xlu0 %492  ;;  %v521_v45 = vpack.c.bf16 %v519_v28, %v518_v23 }
 0x4fc   :  { %v513_v48 = vsel %vm511_vm10, %v508_v42, %v493_v43 }
 0x4fd   :  { %v517_v51 = vmul.f32 %v513_v48, %v3177_v39  ;;  %2415 = vmatprep.subr.bf16.mxu0 %v521_v45 }
 0x4fe   :  { %2416 = vmatpush3.bf16.msra.mxu0 %v521_v45 }
 0x4ff   :  { %v3186_v52 = vpop.permute.xlu0 %2574  ;;  %v520_v12 = vpack.c.bf16 %v517_v51, %v516_v49 }
 0x500   :  { %v2577_v54 = vunpack.i.h.bf16 %v3186_v52  ;;  %v2576_v56 = vunpack.i.l.bf16 %v3186_v52 }
 0x501   :  { %2417 = vmatprep.subr.bf16.mxu0 %v520_v12 }
 0x502   :  { %2418 = vmatpush3.bf16.msra.mxu0 %v520_v12  ;;  %v600_v57 = vmul.f32 %v2576_v56, %v3041_v40  ;;  %v601_v59 = vmul.f32 %v2577_v54, %v3029_v37 }
 0x503   :  { %v3197_v60 = vpop.permute.xlu0 %2584 }
 0x504   :  { %v2587_v63 = vunpack.i.h.bf16 %v3197_v60  ;;  %v2586_v0 = vunpack.i.l.bf16 %v3197_v60  ;;  %v2613_v1 = vpack.i.bf16 %v601_v59, %v600_v57 }
 0x505   :  { %2420 = vmatmul.mubr.msk.bf16.vlgmr.msra.gmra.mxu0 %vm271_vm5, %v739_v61 }
 0x506   :  { %2614 = vrot.lane.b32.xlu0 %v2613_v1, %s2924_s22  ;;  %v596_v3 = vmul.f32 %v2586_v0, %v3041_v40  ;;  %v597_v4 = vmul.f32 %v2587_v63, %v3029_v37 }
 0x507   :  { %v3217_v5 = vpop.permute.xlu0 %2589 }
 0x508   :  { %v3746_v8 = vunpack.i.h.bf16 %v3217_v5  ;;  %v2591_v9 = vunpack.i.l.bf16 %v3217_v5  ;;  %v2633_v10 = vpack.i.bf16 %v597_v4, %v596_v3 }
 0x50a   :  { %2634 = vrot.lane.b32.xlu1 %v2633_v10, %s2924_s22  ;;  %2624 = vrot.lane.b32.xlu0 %v2623_v13, %s2924_s22  ;;  %v594_v14 = vmul.f32 %v2591_v9, %v3024_v34  ;;  %v595_v17 = vmul.f32 %v3746_v8, %v3032_v38 }
 0x50b   :  { %v3229_v18 = vpop.permute.xlu0 %2594 }
 0x50c   :  { %v2597_v19 = vunpack.i.h.bf16 %v3229_v18  ;;  %v2596_v20 = vunpack.i.l.bf16 %v3229_v18  ;;  %v2643_v21 = vpack.i.bf16 %v595_v17, %v594_v14  ;;  %v3754_v18 = vunpack.i.h.bf16 %v3180_v46 }
 0x50e   :  { %2639 = vrot.lane.b32.xlu1 %v3074_v6, %s2929_s5  ;;  %2644 = vrot.lane.b32.xlu0 %v2643_v21, %s2924_s22  ;;  %v592_v23 = vmul.f32 %v2596_v20, %v3041_v40  ;;  %v593_v28 = vmul.f32 %v2597_v19, %v3029_v37 }
 0x50f   :  { %v3242_v33 = vpop.permute.xlu0 %2599 }
 0x510   :  { %v3745_v36 = vunpack.i.h.bf16 %v3242_v33  ;;  %v2601_v42 = vunpack.i.l.bf16 %v3242_v33  ;;  %v2653_v43 = vpack.i.bf16 %v593_v28, %v592_v23 }
 0x512   :  { %2649 = vrot.lane.b32.xlu1 %v3083_v15, %s2929_s5  ;;  %2654 = vrot.lane.b32.xlu0 %v2653_v43, %s2924_s22  ;;  %v590_v6 = vmul.f32 %v2601_v42, %v3024_v34  ;;  %v591_v45 = vmul.f32 %v3745_v36, %v3032_v38 }
 0x513   :  { %v3255_v48 = vpop.permute.xlu0 %2604 }
 0x514   :  { %v3752_v49 = vunpack.i.h.bf16 %v3255_v48  ;;  %v2606_v51 = vunpack.i.l.bf16 %v3255_v48  ;;  %v2663_v12 = vpack.i.bf16 %v591_v45, %v590_v6 }
 0x516   :  { %2659 = vrot.lane.b32.xlu1 %v3091_v22, %s2929_s5  ;;  %2664 = vrot.lane.b32.xlu0 %v2663_v12, %s2924_s22  ;;  %v588_v15 = vmul.f32 %v2606_v51, %v3041_v40  ;;  %v589_v57 = vmul.f32 %v3752_v49, %v3029_v37  ;;  %v3273_v22 = vpop.permute.xlu1 %2619 }
 0x517   :  { %v3275_v61 = vpop.permute.xlu0 %2609  ;;  %v3743_v40 = vunpack.i.h.bf16 %v3273_v22  ;;  %v3744_v1 = vunpack.i.l.bf16 %v3273_v22 }
 0x518   :  { %v2673_v59 = vpack.i.bf16 %v589_v57, %v588_v15  ;;  %v3757_v46 = vunpack.i.l.bf16 %v3275_v61 }
 0x51a   :  { %2669 = vrot.lane.b32.xlu1 %v3103_v35, %s2929_s5  ;;  %2674 = vrot.lane.b32.xlu0 %v2673_v59, %s2924_s22  ;;  %v3277_v62 = vpop.permute.xlu1 %2629 }
 0x51b   :  { %v3741_v35 = vunpack.i.h.bf16 %v3277_v62  ;;  %v3742_v4 = vunpack.i.l.bf16 %v3277_v62 }
 0x51e   :  { %2679 = vrot.lane.b32.xlu1 %v3114_v44, %s2929_s5 }
 0x578   :  { %v2615_v37 = vpop.permute.xlu0 %2614 }
 0x579   :  { %v2617_v2 = vunpack.i.h.bf16 %v2615_v37  ;;  %v2616_v3 = vunpack.i.l.bf16 %v2615_v37 }
 0x57b   :  { %v728_v44 = vsel %vm271_vm5, %v2616_v3, %v3744_v1  ;;  %v729_v10 = vsel %vm271_vm5, %v2617_v2, %v3743_v40 }
 0x57c   :  { %v2635_v13 = vpop.permute.xlu1 %2634  ;;  %v2625_v14 = vpop.permute.xlu0 %2624  ;;  %v737_v17 = vpack.c.bf16 %v729_v10, %v728_v44 }
 0x57d   :  { %v2627_v21 = vunpack.i.h.bf16 %v2625_v14  ;;  %v2626_v23 = vunpack.i.l.bf16 %v2625_v14  ;;  %v2637_v15 = vunpack.i.h.bf16 %v2635_v13  ;;  %v2636_v57 = vunpack.i.l.bf16 %v2635_v13 }
 0x57e   :  { %2423 = vmatprep.subr.bf16.mxu1 %v737_v17 }
 0x57f   :  { %2424 = vmatpush3.bf16.msra.mxu1 %v737_v17  ;;  %v726_v28 = vsel %vm271_vm5, %v2626_v23, %v3742_v4  ;;  %v727_v43 = vsel %vm271_vm5, %v2627_v21, %v3741_v35 }
 0x580   :  { %v3295_v6 = vpop.permute.xlu1 %2639  ;;  %v2645_v45 = vpop.permute.xlu0 %2644  ;;  %v736_v12 = vpack.c.bf16 %v727_v43, %v726_v28 }
 0x581   :  { %v3731_v59 = vunpack.i.h.bf16 %v3295_v6  ;;  %v3734_v37 = vunpack.i.l.bf16 %v3295_v6  ;;  %v2647_v17 = vunpack.i.h.bf16 %v2645_v45  ;;  %v2646_v13 = vunpack.i.l.bf16 %v2645_v45 }
 0x582   :  { %2425 = vmatprep.subr.bf16.mxu1 %v736_v12 }
 0x583   :  { %2426 = vmatpush3.bf16.msra.mxu1 %v736_v12  ;;  %v724_v2 = vsel %vm271_vm5, %v2636_v57, %v3734_v37  ;;  %v725_v3 = vsel %vm271_vm5, %v2637_v15, %v3731_v59 }
 0x584   :  { %v3305_v44 = vpop.permute.xlu1 %2649  ;;  %v2655_v10 = vpop.permute.xlu0 %2654  ;;  %v735_v14 = vpack.c.bf16 %v725_v3, %v724_v2 }
 0x585   :  { %v3732_v21 = vunpack.i.h.bf16 %v3305_v44  ;;  %v3733_v23 = vunpack.i.l.bf16 %v3305_v44  ;;  %v2657_v2 = vunpack.i.h.bf16 %v2655_v10  ;;  %v2656_v45 = vunpack.i.l.bf16 %v2655_v10 }
 0x586   :  { %2427 = vmatprep.subr.bf16.mxu1 %v735_v14 }
 0x587   :  { %2428 = vmatpush3.bf16.msra.mxu1 %v735_v14  ;;  %v722_v28 = vsel %vm271_vm5, %v2646_v13, %v3733_v23  ;;  %v723_v43 = vsel %vm271_vm5, %v2647_v17, %v3732_v21 }
 0x588   :  { %v3315_v12 = vpop.permute.xlu1 %2659  ;;  %v2665_v15 = vpop.permute.xlu0 %2664  ;;  %v734_v57 = vpack.c.bf16 %v723_v43, %v722_v28 }
 0x589   :  { %v3735_v3 = vunpack.i.h.bf16 %v3315_v12  ;;  %v3736_v59 = vunpack.i.l.bf16 %v3315_v12  ;;  %v2667_v28 = vunpack.i.h.bf16 %v2665_v15  ;;  %v2666_v43 = vunpack.i.l.bf16 %v2665_v15 }
 0x58a   :  { %2429 = vmatprep.subr.bf16.mxu1 %v734_v57 }
 0x58b   :  { %2430 = vmatpush3.bf16.msra.mxu1 %v734_v57  ;;  %v720_v14 = vsel %vm271_vm5, %v2656_v45, %v3736_v59  ;;  %v721_v17 = vsel %vm271_vm5, %v2657_v2, %v3735_v3 }
 0x58c   :  { %v3325_v13 = vpop.permute.xlu1 %2669  ;;  %v733_v21 = vpack.c.bf16 %v721_v17, %v720_v14  ;;  %v2675_v37 = vpop.permute.xlu0 %2674 }
 0x58d   :  { %v3737_v10 = vunpack.i.h.bf16 %v3325_v13  ;;  %v3740_v23 = vunpack.i.l.bf16 %v3325_v13  ;;  %v2677_v17 = vunpack.i.h.bf16 %v2675_v37  ;;  %v2676_v15 = vunpack.i.l.bf16 %v2675_v37 }
 0x58e   :  { %2431 = vmatprep.subr.bf16.mxu1 %v733_v21  ;;  %v150_v37 = vshra.s32 %v3096_v29, 4 }
 0x58f   :  { %2432 = vmatpush3.bf16.msra.mxu1 %v733_v21  ;;  %v718_v57 = vsel %vm271_vm5, %v2666_v43, %v3740_v23  ;;  %v719_v2 = vsel %vm271_vm5, %v2667_v28, %v3737_v10  ;;  %v149_v10 = vshra.s32 %v3110_v41, 4 }
 0x590   :  { %v3335_v45 = vpop.permute.xlu1 %2679  ;;  %v732_v14 = vpack.c.bf16 %v719_v2, %v718_v57  ;;  %v147_v57 = vand.u32 31, %v2976_v7 }
 0x591   :  { %v3738_v3 = vunpack.i.h.bf16 %v3335_v45  ;;  %v3739_v59 = vunpack.i.l.bf16 %v3335_v45 }
 0x592   :  { %2433 = vmatprep.subr.bf16.mxu1 %v732_v14  ;;  %v152_v2 = vshra.s32 %v147_v57, 4  ;;  %vm159_vm14 = vcmp.le.s32.totalorder %v147_v57, %v3096_v29  ;;  %vm157_vm1 = vcmp.le.s32.totalorder %v147_v57, %v2995_v55  ;;  %vm158_vm3 = vcmp.le.s32.totalorder %v147_v57, %v3110_v41 }
 0x593   :  { %2434 = vmatpush3.bf16.msra.mxu1 %v732_v14  ;;  %v716_v21 = vsel %vm271_vm5, %v2676_v15, %v3739_v59  ;;  %v717_v43 = vsel %vm271_vm5, %v2677_v17, %v3738_v3  ;;  %v148_v14 = vshra.s32 %v2995_v55, 4  ;;  %v151_v17 = vshra.s32 %v3099_v30, 4 }
 0x594   :  { %v731_v28 = vpack.c.bf16 %v717_v43, %v716_v21  ;;  %vm155_vm13 = vcmp.eq.s32.totalorder %v150_v37, %v152_v2  ;;  %v2930_v15 = vmov -1e+30   ;;  %vm154_vm2 = vcmp.eq.s32.totalorder %v149_v10, %v152_v2 }
 0x595   :  { %vm163_vm15 = vmand %vm155_vm13, %vm159_vm14  ;;  %vm153_vm0 = vcmp.eq.s32.totalorder %v148_v14, %v152_v2  ;;  %vm156_vm6 = vcmp.eq.s32.totalorder %v151_v17, %v152_v2  ;;  %vm160_vm7 = vcmp.le.s32.totalorder %v147_v57, %v3099_v30  ;;  %v3750_v57 = vunpack.i.h.bf16 %v3275_v61 }
 0x596   :  { %2435 = vmatprep.subr.bf16.mxu1 %v731_v28  ;;  %v3352_v21 = vsel %vm163_vm15, 0.0, %v2930_v15  ;;  %vm161_vm4 = vmand %vm153_vm0, %vm157_vm1  ;;  %v3747_v17 = vunpack.i.l.bf16 %v3275_v61 }
 0x597   :  { %2436 = vmatpush3.bf16.msra.mxu1 %v731_v28  ;;  %vm162_vm8 = vmand %vm154_vm2, %vm158_vm3  ;;  %v3357_v43 = vsel %vm161_vm4, 0.0, %v2930_v15 }
 0x598   :  { %vm164_vm11 = vmand %vm156_vm6, %vm160_vm7  ;;  %v3359_v14 = vsel %vm162_vm8, 0.0, %v2930_v15 }
 0x599   :  { %v3362_v3 = vsel %vm164_vm11, 0.0, %v2930_v15  ;;  %v586_v15 = vmul.f32 %v3747_v17, %v3024_v34 }
 0x5c5   :  { %v2421_v7 = vpop.f32.mrf.mxu0 }
 0x5c6   :  { %v789_v29 = vadd.f32 %v2421_v7, %v3352_v21  ;;  %v587_v7 = vmul.f32 %v3750_v57, %v3032_v38 }
 0x5c7   :  { %v780_v28 = vpop.f32.mrf.mxu0 }
 0x5c8   :  { %799 = vmax.xlane.f32.xlu0 %v789_v29  ;;  %v781_v10 = vadd.f32 %v780_v28, %v3357_v43  ;;  %v2683_v28 = vpack.i.bf16 %v587_v7, %v586_v15 }
 0x5c9   :  { %v2422_v37 = vpop.f32.mrf.mxu0 }
 0x5ca   :  { %v792_v30 = vadd.f32 %v2422_v37, %v3362_v3 }
 0x5cb   :  { %v783_v41 = vpop.f32.mrf.mxu0 }
 0x5cc   :  { %v784_v2 = vadd.f32 %v783_v41, %v3359_v14  ;;  %795 = vmax.xlane.f32.xlu0 %v781_v10 }
 0x5ce   :  { %797 = vmax.xlane.f32.xlu1 %v784_v2 }
 0x5d0   :  { %801 = vmax.xlane.f32.xlu0 %v792_v30 }
 0x5df   :  { %2689 = vrot.lane.b32.xlu1 %v3122_v50, %s2929_s5 }
 0x5e6   :  { %2684 = vrot.lane.b32.xlu0 %v2683_v28, %s2924_s22 }
 0x651   :  { %v800_v37 = vpop.xlane.xlu0 %799 }
 0x652   :  { %v805_v41 = vsub.f32 %v789_v29, %v800_v37 }
 0x654   :  { %v811_v1 = vmul.f32 1.442695, %v805_v41  ;;  %v2736_v41 = vld [vmem:[#allocation5 + $0x20] sm:$0xff]  }
 0x655   :  { %v796_v59 = vpop.xlane.xlu0 %795  ;;  %2443 = vmatprep.subr.bf16.mxu0 %v2736_v41 }
 0x656   :  { %v803_v23 = vsub.f32 %v781_v10, %v796_v59  ;;  %2444 = vmatpush3.bf16.msra.mxu0 %v2736_v41 }
 0x657   :  { %v798_v35 = vpop.xlane.xlu1 %797 }
 0x658   :  { %v807_v4 = vmul.f32 1.442695, %v803_v23  ;;  %v804_v40 = vsub.f32 %v784_v2, %v798_v35 }
 0x659   :  { %v802_v50 = vpop.xlane.xlu0 %801 }
 0x65a   :  { %v809_v36 = vmul.f32 1.442695, %v804_v40  ;;  %v806_v8 = vsub.f32 %v792_v30, %v802_v50  ;;  %2772 = vpow2.f32 %v807_v4  ;;  %v2737_v50 = vld [vmem:[#allocation5 + $0x18] sm:$0xff]  }
 0x65b   :  { %v3377_v34 = vpop.permute.xlu1 %2689  ;;  %2445 = vmatprep.subr.bf16.mxu0 %v2737_v50 }
 0x65c   :  { %2774 = vpow2.f32 %v809_v36  ;;  %v813_v17 = vmul.f32 1.442695, %v806_v8  ;;  %v3748_v38 = vunpack.i.h.bf16 %v3377_v34  ;;  %v3749_v15 = vunpack.i.l.bf16 %v3377_v34  ;;  %2446 = vmatpush3.bf16.msra.mxu0 %v2737_v50 }
 0x65d   :  { %2776 = vpow2.f32 %v811_v1  ;;  %v2685_v29 = vpop.permute.xlu0 %2684 }
 0x65e   :  { %2778 = vpow2.f32 %v813_v17  ;;  %v2687_v59 = vunpack.i.h.bf16 %v2685_v29  ;;  %v2686_v10 = vunpack.i.l.bf16 %v2685_v29 }
 0x660   :  { %v714_v35 = vsel %vm271_vm5, %v2686_v10, %v3749_v15  ;;  %v715_v40 = vsel %vm271_vm5, %v2687_v59, %v3748_v38 }
 0x661   :  { %v730_v4 = vpack.c.bf16 %v715_v40, %v714_v35 }
 0x663   :  { %2437 = vmatprep.subr.bf16.mxu1 %v730_v4 }
 0x664   :  { %2438 = vmatpush3.bf16.msra.mxu1 %v730_v4 }
 0x667   :  { %v2773_v8 = vpop.eup %2772 }
 0x669   :  { %v2775_v36 = vpop.eup %2774 }
 0x66a   :  { %v2777_v23 = vpop.eup %2776  ;;  %v815_v2 = vpack.c.bf16 %v2775_v36, %v2773_v8 }
 0x66b   :  { %v2779_v1 = vpop.eup %2778 }
 0x66c   :  { %2439 = vmatprep.mubr.bf16.mxu1 %v815_v2  ;;  %v816_v30 = vpack.c.bf16 %v2779_v1, %v2777_v23 }
 0x66e   :  { %2440 = vmatmul.mubr.bf16.vlgmr.msra.gmra.mxu1 %v816_v30 }
 0x72e   :  { %v2441_v17 = vpop.f32.mrf.mxu1 }
 0x730   :  { %v851_v7 = vpop.f32.mrf.mxu1 }
 0x731   :  { %2780 = vrcp.f32 %v851_v7 }
 0x732   :  { %v2442_v28 = vpop.f32.mrf.mxu1  ;;  %2782 = vrcp.f32 %v2441_v17 }
 0x734   :  { %v854_v37 = vpop.f32.mrf.mxu1 }
 0x735   :  { %2784 = vrcp.f32 %v854_v37 }
 0x736   :  { %2786 = vrcp.f32 %v2442_v28 }
 0x73e   :  { %v2781_v29 = vpop.eup %2780 }
 0x73f   :  { %874 = vrot.lane.b32.xlu0 %v2781_v29, %s2928_s0  ;;  %v2783_v59 = vpop.eup %2782 }
 0x742   :  { %v2785_v10 = vpop.eup %2784 }
 0x743   :  { %878 = vrot.lane.b32.xlu0 %v2783_v59, %s2928_s0  ;;  %876 = vrot.lane.b32.xlu1 %v2785_v10, %s2928_s0  ;;  %v2787_v35 = vpop.eup %2786 }
 0x747   :  { %880 = vrot.lane.b32.xlu1 %v2787_v35, %s2928_s0  ;;  %905 = vrot.lane.b32.xlu0 %v3021_v32, %s2929_s5 }
 0x7b1   :  { %v875_v40 = vpop.permute.xlu0 %874 }
 0x7b2   :  { %v886_v8 = vmul.f32 %v875_v40, %v851_v7 }
 0x7b5   :  { %v877_v4 = vpop.permute.xlu1 %876  ;;  %v879_v23 = vpop.permute.xlu0 %878 }
 0x7b6   :  { %v887_v36 = vmul.f32 %v877_v4, %v854_v37  ;;  %v888_v30 = vmul.f32 %v2441_v17, %v879_v23 }
 0x7b8   :  { %v890_v2 = vpack.c.bf16 %v887_v36, %v886_v8 }
 0x7b9   :  { %v881_v1 = vpop.permute.xlu1 %880  ;;  %v906_v29 = vpop.permute.xlu0 %905 }
 0x7ba   :  { %v889_v41 = vmul.f32 %v2442_v28, %v881_v1  ;;  %2447 = vmatprep.mubr.msk.bf16.mxu0 %vm271_vm5, %v890_v2 }
 0x7bc   :  { %v891_v50 = vpack.c.bf16 %v889_v41, %v888_v30 }
 0x7be   :  { %2448 = vmatmul.mubr.msk.bf16.vlgmr.msra.gmra.mxu0 %vm271_vm5, %v891_v50 }
 0x87e   :  { %v2449_v59 = vpop.f32.mrf.mxu0 }
 0x87f   :  { %v957_v10 = vadd.f32 %v2449_v59, %v906_v29 }
 0x880   :  { %v948_v35 = vpop.f32.mrf.mxu0 }
 0x881   :  { %v949_v38 = vadd.f32 %v948_v35, %v906_v29  ;;  %v965_v32 = vadd.f32 %v957_v10, %v3010_v26 }
 0x882   :  { %v2450_v15 = vpop.f32.mrf.mxu0 }
 0x883   :  { %v973_v7 = vsel %vm271_vm5, %v965_v32, 0.0  ;;  %v963_v37 = vadd.f32 %v949_v38, %v3006_v24  ;;  %v960_v28 = vadd.f32 %v2450_v15, %v906_v29 }
 0x884   :  { %974 = vadd.xlane.f32.xlu0 %v973_v7  ;;  %v951_v17 = vpop.f32.mrf.mxu0 }
 0x885   :  { %v952_v40 = vadd.f32 %v951_v17, %v906_v29  ;;  %v967_v4 = vsel %vm271_vm5, %v963_v37, 0.0  ;;  %v966_v23 = vadd.f32 %v960_v28, %v3012_v27 }
 0x886   :  { %968 = vadd.xlane.f32.xlu1 %v967_v4  ;;  %v2738_v4 = vld [vmem:[#allocation5 + $0x30] sm:$0xff]  }
 0x887   :  { %v964_v8 = vadd.f32 %v952_v40, %v3008_v25  ;;  %v976_v26 = vsel %vm271_vm5, %v966_v23, 0.0  ;;  %2451 = vmatprep.subr.bf16.mxu0 %v2738_v4 }
 0x888   :  { %2452 = vmatpush3.bf16.msra.mxu0 %v2738_v4 }
 0x889   :  { %v970_v36 = vsel %vm271_vm5, %v964_v8, 0.0 }
 0x88a   :  { %971 = vadd.xlane.f32.xlu0 %v970_v36 }
 0x88e   :  { %977 = vadd.xlane.f32.xlu0 %v976_v26 }
 0x90d   :  { %v975_v2 = vpop.xlane.xlu0 %974 }
 0x90e   :  { %v981_v1 = vmul.f32 0.03125, %v975_v2 }
 0x90f   :  { %v969_v24 = vpop.xlane.xlu1 %968 }
 0x910   :  { %v985_v38 = vsub.f32 %v965_v32, %v981_v1  ;;  %v979_v30 = vmul.f32 0.03125, %v969_v24 }
 0x912   :  { %v983_v15 = vsub.f32 %v963_v37, %v979_v30  ;;  %v989_v41 = vmul.f32 %v985_v38, %v985_v38 }
 0x913   :  { %v972_v50 = vpop.xlane.xlu0 %971 }
 0x914   :  { %v980_v29 = vmul.f32 0.03125, %v972_v50  ;;  %v997_v59 = vsel %vm271_vm5, %v989_v41, 0.0  ;;  %v987_v25 = vmul.f32 %v983_v15, %v983_v15 }
 0x915   :  { %998 = vadd.xlane.f32.xlu1 %v997_v59 }
 0x916   :  { %v984_v10 = vsub.f32 %v964_v8, %v980_v29  ;;  %v991_v7 = vsel %vm271_vm5, %v987_v25, 0.0  ;;  %v2739_v8 = vld [vmem:[#allocation5 + $0x28] sm:$0xff]  }
 0x917   :  { %v978_v35 = vpop.xlane.xlu0 %977  ;;  %2453 = vmatprep.subr.bf16.mxu0 %v2739_v8 }
 0x918   :  { %v982_v27 = vmul.f32 0.03125, %v978_v35  ;;  %v988_v17 = vmul.f32 %v984_v10, %v984_v10  ;;  %2454 = vmatpush3.bf16.msra.mxu0 %v2739_v8 }
 0x919   :  { %992 = vadd.xlane.f32.xlu1 %v991_v7 }
 0x91a   :  { %v986_v28 = vsub.f32 %v966_v23, %v982_v27  ;;  %v994_v40 = vsel %vm271_vm5, %v988_v17, 0.0 }
 0x91b   :  { %995 = vadd.xlane.f32.xlu0 %v994_v40 }
 0x91c   :  { %v990_v32 = vmul.f32 %v986_v28, %v986_v28 }
 0x91e   :  { %v1000_v37 = vsel %vm271_vm5, %v990_v32, 0.0 }
 0x91f   :  { %1001 = vadd.xlane.f32.xlu0 %v1000_v37 }
 0x92a   :  { %1019 = vrot.lane.b32.xlu1 %v2998_v58, %s2924_s22 }
 0x935   :  { %1026 = vrot.lane.b32.xlu0 %v2998_v58, %s2929_s5 }
 0x99e   :  { %v999_v36 = vpop.xlane.xlu1 %998 }
 0x99f   :  { %v1005_v23 = vmul.f32 0.03125, %v999_v36 }
 0x9a1   :  { %v1009_v26 = vadd.f32 1e-05, %v1005_v23 }
 0x9a2   :  { %v993_v2 = vpop.xlane.xlu1 %992 }
 0x9a3   :  { %v1003_v1 = vmul.f32 0.03125, %v993_v2  ;;  %2788 = vrsqrt.f32 %v1009_v26 }
 0x9a4   :  { %v996_v24 = vpop.xlane.xlu0 %995 }
 0x9a5   :  { %v1007_v30 = vadd.f32 1e-05, %v1003_v1  ;;  %v1004_v41 = vmul.f32 0.03125, %v996_v24 }
 0x9a6   :  { %v1020_v17 = vpop.permute.xlu1 %1019 }
 0x9a7   :  { %2790 = vrsqrt.f32 %v1007_v30  ;;  %v1008_v50 = vadd.f32 1e-05, %v1004_v41 }
 0x9a8   :  { %v1002_v29 = vpop.xlane.xlu0 %1001 }
 0x9a9   :  { %2792 = vrsqrt.f32 %v1008_v50  ;;  %v1006_v58 = vmul.f32 0.03125, %v1002_v29  ;;  %v2742_v50 = vld [vmem:[#allocation5 + $0x60] sm:$0xff]   ;;  %v2743_v29 = vld [vmem:[#allocation5 + $0x58] sm:$0xff]  }
 0x9ab   :  { %v1010_v59 = vadd.f32 1e-05, %v1006_v58  ;;  %v2744_v58 = vld [vmem:[#allocation5 + $0x50] sm:$0xff]  }
 0x9ac   :  { %v1027_v36 = vpop.permute.xlu0 %1026 }
 0x9ad   :  { %2794 = vrsqrt.f32 %v1010_v59  ;;  %v2745_v59 = vld [vmem:[#allocation5 + $0x48] sm:$0xff]  }
 0x9b0   :  { %v2789_v25 = vpop.eup %2788 }
 0x9b1   :  { %v1017_v32 = vmul.f32 %v2789_v25, %v985_v38  ;;  %v2746_v25 = vld [vmem:[#allocation5 + $0x40] sm:$0xff]  }
 0x9b3   :  { %v1024_v26 = vmul.f32 %v1020_v17, %v1017_v32 }
 0x9b4   :  { %v2791_v35 = vpop.eup %2790 }
 0x9b5   :  { %v1015_v27 = vmul.f32 %v2791_v35, %v983_v15  ;;  %v3417_v41 = vadd.f32 %v1027_v36, %v1024_v26  ;;  %v2747_v35 = vld [vmem:[#allocation5 + $0x38] sm:$0xff]  }
 0x9b6   :  { %v2793_v7 = vpop.eup %2792 }
 0x9b7   :  { %v1016_v40 = vmul.f32 %v2793_v7, %v984_v10  ;;  %v1022_v37 = vmul.f32 %v1020_v17, %v1015_v27  ;;  %v2740_v10 = vld [vmem:[#allocation5 + $0x70] sm:$0xff]   ;;  %v1037_v27 = vsub.s32 2, %v2995_v55 }
 0x9b8   :  { %2459 = vmatprep.subr.bf16.mxu0 %v2740_v10  ;;  %v3426_v7 = vld [vmem:[#allocation2 + $0x20] sm:$0xff] }
 0x9b9   :  { %v1023_v4 = vmul.f32 %v1020_v17, %v1016_v40  ;;  %v3411_v2 = vadd.f32 %v1027_v36, %v1022_v37 }
 0x9ba   :  { %v2795_v8 = vpop.eup %2794 }
 0x9bb   :  { %v1018_v23 = vmul.f32 %v2795_v8, %v986_v28  ;;  %v3413_v1 = vadd.f32 %v1027_v36, %v1023_v4  ;;  %v2741_v28 = vld [vmem:[#allocation5 + $0x68] sm:$0xff]  }
 0x9bd   :  { %v1025_v24 = vmul.f32 %v1020_v17, %v1018_v23  ;;  %v1033_v30 = vpack.c.bf16 %v3413_v1, %v3411_v2  ;;  %v1038_v17 = vrot.slane %v3426_v7, %v1037_v27 }
 0x9bf   :  { %v3419_v15 = vadd.f32 %v1027_v36, %v1025_v24  ;;  %2455 = vmatprep.mubr.msk.bf16.mxu0 %vm271_vm5, %v1033_v30 }
 0x9c1   :  { %v1034_v38 = vpack.c.bf16 %v3419_v15, %v3417_v41 }
 0x9c3   :  { %2456 = vmatmul.mubr.msk.bf16.vlgmr.msra.gmra.mxu0 %vm271_vm5, %v1034_v38 }
 0x9c4   :  { %2460 = vmatpush3.bf16.msra.mxu0 %v2740_v10 }
 0x9c5   :  { %2461 = vmatprep.subr.bf16.mxu0 %v2741_v28 }
 0x9c8   :  { %2462 = vmatpush3.bf16.msra.mxu0 %v2741_v28 }
 0x9c9   :  { %2463 = vmatprep.subr.bf16.mxu0 %v2742_v50 }
 0x9cc   :  { %2464 = vmatpush3.bf16.msra.mxu0 %v2742_v50 }
 0x9cd   :  { %2465 = vmatprep.subr.bf16.mxu0 %v2743_v29 }
 0x9d0   :  { %2466 = vmatpush3.bf16.msra.mxu0 %v2743_v29 }
 0x9d1   :  { %2467 = vmatprep.subr.bf16.mxu0 %v2744_v58 }
 0x9d4   :  { %2468 = vmatpush3.bf16.msra.mxu0 %v2744_v58 }
 0x9d5   :  { %2469 = vmatprep.subr.bf16.mxu0 %v2745_v59 }
 0x9d8   :  { %2470 = vmatpush3.bf16.msra.mxu0 %v2745_v59 }
 0x9d9   :  { %2471 = vmatprep.subr.bf16.mxu0 %v2746_v25 }
 0x9dc   :  { %2472 = vmatpush3.bf16.msra.mxu0 %v2746_v25 }
 0x9dd   :  { %2473 = vmatprep.subr.bf16.mxu0 %v2747_v35 }
 0x9e0   :  { %2474 = vmatpush3.bf16.msra.mxu0 %v2747_v35 }
 0xa83   :  { %v2457_v40 = vpop.f32.mrf.mxu0 }
 0xa84   :  { %v1100_v32 = vadd.f32 %v2457_v40, %v1038_v17 }
 0xa85   :  { %v1091_v37 = vpop.f32.mrf.mxu0 }
 0xa86   :  { %v1092_v4 = vadd.f32 %v1091_v37, %v1038_v17  ;;  %v1112_v8 = vmul.f32 0.70710677, %v1100_v32 }
 0xa87   :  { %v2458_v36 = vpop.f32.mrf.mxu0 }
 0xa88   :  { %v1110_v23 = vmul.f32 0.70710677, %v1092_v4  ;;  %v1103_v26 = vadd.f32 %v2458_v36, %v1038_v17  ;;  %v1106_v40 = vmul.f32 0.5, %v1092_v4  ;;  %v1108_v36 = vmul.f32 0.5, %v1100_v32 }
 0xa89   :  { %v1094_v24 = vpop.f32.mrf.mxu0 }
 0xa8a   :  { %2796 = verf.f32 %v1110_v23  ;;  %v1113_v30 = vmul.f32 0.70710677, %v1103_v26  ;;  %v1095_v38 = vadd.f32 %v1094_v24, %v1038_v17  ;;  %v1109_v27 = vmul.f32 0.5, %v1103_v26 }
 0xa8b   :  { %2798 = verf.f32 %v1112_v8 }
 0xa8c   :  { %2800 = verf.f32 %v1113_v30  ;;  %v1111_v10 = vmul.f32 0.70710677, %v1095_v38  ;;  %v1107_v37 = vmul.f32 0.5, %v1095_v38  ;;  %v1130_v30 = vsub.s32 3, %v2995_v55 }
 0xa8e   :  { %2802 = verf.f32 %v1111_v10  ;;  %v1131_v10 = vrot.slane %v3426_v7, %v1130_v30 }
 0xa97   :  { %v2797_v28 = vpop.eup %2796 }
 0xa98   :  { %v2799_v50 = vpop.eup %2798  ;;  %v1118_v58 = vadd.f32 1.0, %v2797_v28 }
 0xa99   :  { %v2801_v29 = vpop.eup %2800  ;;  %v1120_v35 = vadd.f32 1.0, %v2799_v50 }
 0xa9a   :  { %v1121_v59 = vadd.f32 1.0, %v2801_v29  ;;  %v1122_v23 = vmul.f32 %v1118_v58, %v1106_v40 }
 0xa9b   :  { %v2803_v25 = vpop.eup %2802  ;;  %v1124_v17 = vmul.f32 %v1120_v35, %v1108_v36 }
 0xa9c   :  { %v1119_v57 = vadd.f32 1.0, %v2803_v25  ;;  %v1125_v47 = vmul.f32 %v1121_v59, %v1109_v27 }
 0xa9e   :  { %v1123_v49 = vmul.f32 %v1119_v57, %v1107_v37  ;;  %v1127_v24 = vpack.c.bf16 %v1125_v47, %v1124_v17 }
 0xaa0   :  { %v1126_v8 = vpack.c.bf16 %v1123_v49, %v1122_v23 }
 0xaa2   :  { %2475 = vmatprep.mubr.bf16.mxu0 %v1126_v8 }
 0xaa3   :  { %2476 = vmatmul.mubr.bf16.vlgmr.msra.gmra.mxu0 %v1127_v24 }
 0xb63   :  { %v2477_v28 = vpop.f32.mrf.mxu0 }
 0xb64   :  { %v1223_v50 = vadd.f32 %v2477_v28, %v1131_v10 }
 0xb65   :  { %v1214_v29 = vpop.f32.mrf.mxu0 }
 0xb66   :  { %v1215_v26 = vadd.f32 %v1214_v29, %v1131_v10  ;;  %v1231_v47 = vadd.f32 %v1223_v50, %v3417_v41 }
 0xb67   :  { %v2478_v4 = vpop.f32.mrf.mxu0 }
 0xb68   :  { %v1229_v38 = vadd.f32 %v1215_v26, %v3411_v2  ;;  %v1226_v59 = vadd.f32 %v2478_v4, %v1131_v10  ;;  %v1267_v35 = vsel %vm271_vm5, %v1231_v47, 0.0 }
 0xb69   :  { %v1217_v32 = vpop.f32.mrf.mxu0 }
 0xb6a   :  { %v1218_v58 = vadd.f32 %v1217_v32, %v1131_v10  ;;  %v1261_v57 = vsel %vm271_vm5, %v1229_v38, 0.0  ;;  %v1232_v27 = vadd.f32 %v1226_v59, %v3419_v15 }
 0xb6b   :  { %1262 = vadd.xlane.f32.xlu1 %v1261_v57 }
 0xb6c   :  { %v1230_v49 = vadd.f32 %v1218_v58, %v3413_v1  ;;  %v1270_v2 = vsel %vm271_vm5, %v1232_v27, 0.0 }
 0xb6e   :  { %v1264_v25 = vsel %vm271_vm5, %v1230_v49, 0.0 }
 0xb6f   :  { %1265 = vadd.xlane.f32.xlu0 %v1264_v25  ;;  %1268 = vadd.xlane.f32.xlu1 %v1267_v35 }
 0xb73   :  { %1271 = vadd.xlane.f32.xlu0 %v1270_v2 }
 0xbf4   :  { %v1263_v40 = vpop.xlane.xlu1 %1262 }
 0xbf5   :  { %v1273_v37 = vmul.f32 0.03125, %v1263_v40 }
 0xbf7   :  { %v1277_v8 = vsub.f32 %v1229_v38, %v1273_v37  ;;  %v1315_v38 = vsub.s32 4, %v2995_v55 }
 0xbf8   :  { %v1266_v36 = vpop.xlane.xlu0 %1265  ;;  %v1269_v23 = vpop.xlane.xlu1 %1268 }
 0xbf9   :  { %v1274_v17 = vmul.f32 0.03125, %v1266_v36  ;;  %v1275_v41 = vmul.f32 0.03125, %v1269_v23  ;;  %v1281_v4 = vmul.f32 %v1277_v8, %v1277_v8  ;;  %v3445_v57 = vrot.slane %v3426_v7, %v1315_v38 }
 0xbfb   :  { %v1278_v24 = vsub.f32 %v1230_v49, %v1274_v17  ;;  %v1279_v1 = vsub.f32 %v1231_v47, %v1275_v41  ;;  %v1285_v58 = vsel %vm271_vm5, %v1281_v4, 0.0  ;;  %v2748_v47 = vld [vmem:[#allocation5 + $0x80] sm:$0xff]   ;;  %v2749_v49 = vld [vmem:[#allocation5 + $0x78] sm:$0xff]  }
 0xbfc   :  { %v1272_v30 = vpop.xlane.xlu0 %1271  ;;  %2479 = vmatprep.subr.bf16.mxu1 %v2748_v47 }
 0xbfd   :  { %v1276_v10 = vmul.f32 0.03125, %v1272_v30  ;;  %v1282_v28 = vmul.f32 %v1278_v24, %v1278_v24  ;;  %v1283_v29 = vmul.f32 %v1279_v1, %v1279_v1  ;;  %2480 = vmatpush3.bf16.msra.mxu1 %v2748_v47 }
 0xbfe   :  { %2481 = vmatprep.subr.bf16.mxu1 %v2749_v49 }
 0xbff   :  { %v1280_v50 = vsub.f32 %v1232_v27, %v1276_v10  ;;  %v1288_v15 = vsel %vm271_vm5, %v1282_v28, 0.0  ;;  %v1291_v26 = vsel %vm271_vm5, %v1283_v29, 0.0 }
 0xc00   :  { %1289 = vadd.xlane.f32.xlu0 %v1288_v15  ;;  %1292 = vadd.xlane.f32.xlu1 %v1291_v26 }
 0xc01   :  { %v1284_v32 = vmul.f32 %v1280_v50, %v1280_v50  ;;  %2482 = vmatpush3.bf16.msra.mxu1 %v2749_v49 }
 0xc03   :  { %v1294_v59 = vsel %vm271_vm5, %v1284_v32, 0.0 }
 0xc04   :  { %1295 = vadd.xlane.f32.xlu0 %v1294_v59  ;;  %1286 = vadd.xlane.f32.xlu1 %v1285_v58 }
 0xc15   :  { %1322 = vrot.lane.b32.xlu1 %v3445_v57, %s2928_s0 }
 0xc89   :  { %v1290_v25 = vpop.xlane.xlu0 %1289  ;;  %v1293_v35 = vpop.xlane.xlu1 %1292 }
 0xc8a   :  { %v1298_v27 = vmul.f32 0.03125, %v1290_v25  ;;  %v1299_v2 = vmul.f32 0.03125, %v1293_v35 }
 0xc8c   :  { %v1302_v40 = vadd.f32 1e-05, %v1298_v27  ;;  %v1303_v37 = vadd.f32 1e-05, %v1299_v2 }
 0xc8d   :  { %v1296_v36 = vpop.xlane.xlu0 %1295  ;;  %v1287_v23 = vpop.xlane.xlu1 %1286 }
 0xc8e   :  { %2804 = vrsqrt.f32 %v1302_v40  ;;  %v1300_v17 = vmul.f32 0.03125, %v1296_v36  ;;  %v1297_v41 = vmul.f32 0.03125, %v1287_v23 }
 0xc8f   :  { %2806 = vrsqrt.f32 %v1303_v37 }
 0xc90   :  { %v1304_v30 = vadd.f32 1e-05, %v1300_v17  ;;  %v1301_v10 = vadd.f32 1e-05, %v1297_v41 }
 0xc91   :  { %v1323_v49 = vpop.permute.xlu1 %1322 }
 0xc92   :  { %2808 = vrsqrt.f32 %v1304_v30 }
 0xc93   :  { %2810 = vrsqrt.f32 %v1301_v10 }
 0xc9b   :  { %v2805_v28 = vpop.eup %2804 }
 0xc9c   :  { %v2807_v29 = vpop.eup %2806  ;;  %v1310_v15 = vmul.f32 %v2805_v28, %v1278_v24 }
 0xc9d   :  { %v1311_v26 = vmul.f32 %v2807_v29, %v1279_v1 }
 0xc9e   :  { %v1318_v47 = vmul.f32 %v3445_v57, %v1310_v15 }
 0xc9f   :  { %v2809_v4 = vpop.eup %2808  ;;  %v1319_v58 = vmul.f32 %v3445_v57, %v1311_v26 }
 0xca0   :  { %v2811_v32 = vpop.eup %2810  ;;  %v1312_v59 = vmul.f32 %v2809_v4, %v1280_v50  ;;  %v3459_v24 = vadd.f32 %v1323_v49, %v1318_v47  ;;  %v1333_v50 = vsub.s32 5, %v2995_v55  ;;  %v3755_v47 = vunpack.i.h.bf16 %v3217_v5 }
 0xca1   :  { %v1309_v38 = vmul.f32 %v2811_v32, %v1277_v8  ;;  %v3453_v27 = vadd.f32 %v1323_v49, %v1319_v58 }
 0xca2   :  { %v1320_v25 = vmul.f32 %v3445_v57, %v1312_v59  ;;  %v3469_v37 = vrot.slane %v3426_v7, %v1333_v50 }
 0xca3   :  { %v1317_v35 = vmul.f32 %v3445_v57, %v1309_v38 }
 0xca4   :  { %v3455_v2 = vadd.f32 %v1323_v49, %v1320_v25 }
 0xca5   :  { %v3457_v40 = vadd.f32 %v1323_v49, %v1317_v35  ;;  %v3756_v49 = vunpack.i.h.bf16 %v3242_v33 }
 0xca6   :  { %v1330_v1 = vpack.c.bf16 %v3455_v2, %v3453_v27 }
 0xca7   :  { %v1329_v8 = vpack.c.bf16 %v3459_v24, %v3457_v40 }
 0xca9   :  { %2483 = vmatprep.mubr.msk.bf16.mxu1 %vm271_vm5, %v1329_v8  ;;  %v3758_v8 = vunpack.i.h.bf16 %v3275_v61 }
 0xcaa   :  { %2484 = vmatmul.mubr.msk.bf16.vlgmr.msra.gmra.mxu1 %vm271_vm5, %v1330_v1 }
 0xd6a   :  { %v2485_v36 = vpop.f32.mrf.mxu1 }
 0xd6b   :  { %v3472_v23 = vadd.f32 %v2485_v36, %v3469_v37 }
 0xd6c   :  { %v1387_v17 = vpop.f32.mrf.mxu1 }
 0xd6d   :  { %v1388_v41 = vadd.f32 %v1387_v17, %v3469_v37  ;;  %1410 = vrot.lane.b32.xlu1 %v3472_v23, %s2928_s0  ;;  %v1522_v28 = vmul.f32 %v2576_v56, %v3472_v23  ;;  %v1518_v26 = vmul.f32 %v2586_v0, %v3472_v23  ;;  %v3492_v4 = vmul.f32 %v2596_v20, %v3472_v23 }
 0xd6e   :  { %v2486_v30 = vpop.f32.mrf.mxu1  ;;  %v3497_v32 = vmul.f32 %v2606_v51, %v3472_v23 }
 0xd6f   :  { %v3478_v10 = vadd.f32 %v2486_v30, %v3469_v37  ;;  %1406 = vrot.lane.b32.xlu0 %v1388_v41, %s2928_s0  ;;  %v1520_v15 = vmul.f32 %v2581_v53, %v1388_v41  ;;  %v3515_v51 = vmul.f32 %v2591_v9, %v1388_v41  ;;  %v3519_v52 = vmul.f32 %v2601_v42, %v1388_v41 }
 0xd70   :  { %v1390_v29 = vpop.f32.mrf.mxu1  ;;  %v3544_v1 = vmul.f32 %v3757_v46, %v1388_v41 }
 0xd71   :  { %v1391_v56 = vadd.f32 %v1390_v29, %v3469_v37  ;;  %v1523_v53 = vmul.f32 %v2577_v54, %v3478_v10  ;;  %v1519_v0 = vmul.f32 %v2587_v63, %v3478_v10  ;;  %v1613_v59 = vpack.c.bf16 %v3478_v10, %v3472_v23 }
 0xd72   :  { %v3511_v20 = vmul.f32 %v2597_v19, %v3478_v10  ;;  %v3753_v54 = vunpack.i.h.bf16 %v3255_v48  ;;  %v3763_v23 = vunpack.i.l.bf16 %v3295_v6 }
 0xd73   :  { %1408 = vrot.lane.b32.xlu1 %v1391_v56, %s2928_s0  ;;  %v1612_v63 = vpack.c.bf16 %v1391_v56, %v1388_v41  ;;  %v2693_v58 = vpack.i.bf16 %v1523_v53, %v1522_v28  ;;  %v1521_v19 = vmul.f32 %v3754_v18, %v1391_v56  ;;  %v2703_v38 = vpack.i.bf16 %v1519_v0, %v1518_v26 }
 0xd74   :  { %v3524_v60 = vmul.f32 %v3753_v54, %v3478_v10  ;;  %v2713_v9 = vpack.i.bf16 %v3511_v20, %v3492_v4  ;;  %v3533_v42 = vmul.f32 %v3755_v47, %v1391_v56  ;;  %v3537_v48 = vmul.f32 %v3756_v49, %v1391_v56 }
 0xd75   :  { %2491 = vmatprep.mubr.msk.bf16.mxu1 %vm271_vm5, %v1612_v63  ;;  %v2698_v35 = vpack.i.bf16 %v1521_v19, %v1520_v15  ;;  %v3548_v50 = vmul.f32 %v3758_v8, %v1391_v56 }
 0xd76   :  { %v2708_v5 = vpack.i.bf16 %v3533_v42, %v3515_v51  ;;  %v2718_v33 = vpack.i.bf16 %v3537_v48, %v3519_v52 }
 0xd77   :  { %1412 = vrot.lane.b32.xlu1 %v3478_v10, %s2928_s0 }
 0xddf   :  { %v1411_v17 = vpop.permute.xlu1 %1410 }
 0xde1   :  { %v1407_v30 = vpop.permute.xlu0 %1406 }
 0xde2   :  { %1418 = vxpose.xlu0.b32.start [1/4] (short) (narrow) %v1407_v30, 32 }
 0xde5   :  { %v1409_v41 = vpop.permute.xlu1 %1408 }
 0xde6   :  { %1419 = vxpose.xlu0.b32.cont [2/4] (short) (narrow) %v1409_v41, 32 }
 0xde9   :  { %v1413_v61 = vpop.permute.xlu1 %1412 }
 0xdea   :  { %1420 = vxpose.xlu0.b32.cont [3/4] (short) (narrow) %v1411_v17, 32 }
 0xdee   :  { %1421 = vxpose.xlu0.b32.end [4/4] (short) (narrow) %v1413_v61, 32 }
 0xe5e   :  { %v1434_v28 = vpop.trf.xlu0 }
 0xe5f   :  { %1478 = vrot.lane.b32.xlu0 %v1434_v28, %s2928_s0  ;;  %1454 = vrot.lane.b32.xlu1 %v1434_v28, %s2929_s5 }
 0xe62   :  { %v1435_v29 = vpop.trf.xlu0 }
 0xe63   :  { %1466 = vrot.lane.b32.xlu1 %v1434_v28, %s2924_s22 }
 0xe66   :  { %v1436_v15 = vpop.trf.xlu0 }
 0xe67   :  { %1456 = vrot.lane.b32.xlu1 %v1435_v29, %s2929_s5 }
 0xe6a   :  { %v1437_v26 = vpop.trf.xlu0 }
 0xe6b   :  { %1468 = vrot.lane.b32.xlu1 %v1435_v29, %s2924_s22 }
 0xe6f   :  { %1458 = vrot.lane.b32.xlu1 %v1436_v15, %s2929_s5 }
 0xe73   :  { %1470 = vrot.lane.b32.xlu1 %v1436_v15, %s2924_s22 }
 0xe77   :  { %1482 = vrot.lane.b32.xlu1 %v1436_v15, %s2928_s0 }
 0xe7b   :  { %1460 = vrot.lane.b32.xlu1 %v1437_v26, %s2929_s5 }
 0xe7f   :  { %1472 = vrot.lane.b32.xlu1 %v1437_v26, %s2924_s22 }
 0xe83   :  { %1484 = vrot.lane.b32.xlu1 %v1437_v26, %s2928_s0 }
 0xe87   :  { %1480 = vrot.lane.b32.xlu1 %v1435_v29, %s2928_s0 }
 0xe8b   :  { %2694 = vrot.lane.b32.xlu1 %v2693_v58, %s2924_s22 }
 0xe8f   :  { %2699 = vrot.lane.b32.xlu1 %v2698_v35, %s2924_s22 }
 0xe93   :  { %2704 = vrot.lane.b32.xlu1 %v2703_v38, %s2924_s22 }
 0xed1   :  { %v1455_v56 = vpop.permute.xlu1 %1454  ;;  %v1479_v36 = vpop.permute.xlu0 %1478 }
 0xed2   :  { %v1490_v17 = vsel %vm271_vm5, %v1434_v28, %v1455_v56 }
 0xed5   :  { %v1467_v53 = vpop.permute.xlu1 %1466 }
 0xed6   :  { %v1494_v38 = vsel %vm506_vm9, %v1490_v17, %v1467_v53  ;;  %v3761_v17 = vunpack.i.l.bf16 %v3277_v62 }
 0xed9   :  { %v1457_v0 = vpop.permute.xlu1 %1456 }
 0xeda   :  { %v1491_v28 = vsel %vm271_vm5, %v1435_v29, %v1457_v0 }
 0xedd   :  { %v1469_v54 = vpop.permute.xlu1 %1468 }
 0xede   :  { %v1495_v56 = vsel %vm506_vm9, %v1491_v28, %v1469_v54 }
 0xee1   :  { %v1459_v63 = vpop.permute.xlu1 %1458 }
 0xee2   :  { %v1492_v46 = vsel %vm271_vm5, %v1436_v15, %v1459_v63  ;;  %v1498_v63 = vsel %vm511_vm10, %v1494_v38, %v1479_v36  ;;  %v3759_v36 = vunpack.i.l.bf16 %v3273_v22 }
 0xee5   :  { %v1471_v18 = vpop.permute.xlu1 %1470 }
 0xee6   :  { %v1496_v8 = vsel %vm506_vm9, %v1492_v46, %v1471_v18 }
 0xee9   :  { %v1483_v19 = vpop.permute.xlu1 %1482 }
 0xeea   :  { %v1500_v58 = vsel %vm511_vm10, %v1496_v8, %v1483_v19  ;;  %v1502_v19 = vmul.f32 %v1498_v63, %v3172_v31 }
 0xeeb   :  { %v1504_v25 = vmul.f32 %v1500_v58, %v3158_v11 }
 0xeed   :  { %v1461_v47 = vpop.permute.xlu1 %1460 }
 0xeee   :  { %v1493_v35 = vsel %vm271_vm5, %v1437_v26, %v1461_v47 }
 0xef1   :  { %v1473_v49 = vpop.permute.xlu1 %1472 }
 0xef2   :  { %v1497_v30 = vsel %vm506_vm9, %v1493_v35, %v1473_v49  ;;  %v3762_v35 = vunpack.i.h.bf16 %v3277_v62 }
 0xef5   :  { %v1485_v41 = vpop.permute.xlu1 %1484 }
 0xef6   :  { %v1501_v61 = vsel %vm511_vm10, %v1497_v30, %v1485_v41 }
 0xef7   :  { %v1505_v15 = vmul.f32 %v1501_v61, %v3163_v16 }
 0xef9   :  { %v1481_v18 = vpop.permute.xlu1 %1480  ;;  %v1507_v26 = vpack.c.bf16 %v1505_v15, %v1504_v25  ;;  %v3760_v25 = vunpack.i.h.bf16 %v3273_v22 }
 0xefa   :  { %v1499_v53 = vsel %vm511_vm10, %v1495_v56, %v1481_v18 }
 0xefb   :  { %v1503_v47 = vmul.f32 %v1499_v53, %v3177_v39  ;;  %2487 = vmatprep.subr.bf16.mxu1 %v1507_v26 }
 0xefc   :  { %2488 = vmatpush3.bf16.msra.mxu1 %v1507_v26 }
 0xefd   :  { %v2695_v49 = vpop.permute.xlu1 %2694  ;;  %v1506_v11 = vpack.c.bf16 %v1503_v47, %v1502_v19 }
 0xefe   :  { %v2697_v46 = vunpack.i.h.bf16 %v2695_v49  ;;  %v2696_v16 = vunpack.i.l.bf16 %v2695_v49 }
 0xeff   :  { %2489 = vmatprep.subr.bf16.mxu1 %v1506_v11 }
 0xf00   :  { %2490 = vmatpush3.bf16.msra.mxu1 %v1506_v11  ;;  %v1602_v29 = vsel %vm271_vm5, %v2696_v16, %v3759_v36  ;;  %v1603_v0 = vsel %vm271_vm5, %v2697_v46, %v3760_v25  ;;  %v3768_v46 = vunpack.i.h.bf16 %v3305_v44  ;;  %v3769_v25 = vunpack.i.l.bf16 %v3315_v12 }
 0xf01   :  { %v2700_v54 = vpop.permute.xlu1 %2699  ;;  %v1611_v31 = vpack.c.bf16 %v1603_v0, %v1602_v29 }
 0xf02   :  { %v2702_v8 = vunpack.i.h.bf16 %v2700_v54  ;;  %v2701_v39 = vunpack.i.l.bf16 %v2700_v54  ;;  %v3770_v54 = vunpack.i.h.bf16 %v3315_v12 }
 0xf03   :  { %2492 = vmatmul.mubr.msk.bf16.vlgmr.msra.gmra.mxu1 %vm271_vm5, %v1613_v59  ;;  %2495 = vmatprep.subr.bf16.mxu1 %v1611_v31  ;;  %v3764_v59 = vunpack.i.h.bf16 %v3295_v6  ;;  %v3765_v6 = vpack.i.bf16 %v3524_v60, %v3497_v32 }
 0xf04   :  { %2496 = vmatpush3.bf16.msra.mxu1 %v1611_v31  ;;  %v1600_v58 = vsel %vm271_vm5, %v2701_v39, %v3761_v17  ;;  %v1601_v22 = vsel %vm271_vm5, %v2702_v8, %v3762_v35 }
 0xf05   :  { %v2705_v38 = vpop.permute.xlu1 %2704  ;;  %v1610_v30 = vpack.c.bf16 %v1601_v22, %v1600_v58 }
 0xf06   :  { %v2707_v41 = vunpack.i.h.bf16 %v2705_v38  ;;  %v2706_v61 = vunpack.i.l.bf16 %v2705_v38  ;;  %v3772_v38 = vunpack.i.h.bf16 %v3325_v13 }
 0xf07   :  { %2497 = vmatprep.subr.bf16.mxu1 %v1610_v30 }
 0xf08   :  { %2498 = vmatpush3.bf16.msra.mxu1 %v1610_v30  ;;  %v1598_v10 = vsel %vm271_vm5, %v2706_v61, %v3763_v23  ;;  %v1599_v15 = vsel %vm271_vm5, %v2707_v41, %v3764_v59  ;;  %v3773_v59 = vunpack.i.l.bf16 %v3335_v45 }
 0xf09   :  { %v1609_v63 = vpack.c.bf16 %v1599_v15, %v1598_v10 }
 0xf0b   :  { %2499 = vmatprep.subr.bf16.mxu1 %v1609_v63 }
 0xf0c   :  { %2500 = vmatpush3.bf16.msra.mxu1 %v1609_v63  ;;  %v3774_v63 = vunpack.i.h.bf16 %v3335_v45 }
 0xfc3   :  { %v2493_v62 = vpop.f32.mrf.mxu1 }
 0xfc4   :  { %v1663_v28 = vadd.f32 %v2493_v62, %v3352_v21 }
 0xfc5   :  { %v1654_v56 = vpop.f32.mrf.mxu1 }
 0xfc6   :  { %1673 = vmax.xlane.f32.xlu1 %v1663_v28  ;;  %v1655_v26 = vadd.f32 %v1654_v56, %v3357_v43 }
 0xfc7   :  { %v2494_v18 = vpop.f32.mrf.mxu1 }
 0xfc8   :  { %v1666_v47 = vadd.f32 %v2494_v18, %v3362_v3  ;;  %v3766_v3 = vpack.i.bf16 %v3548_v50, %v3544_v1  ;;  %v3767_v1 = vunpack.i.l.bf16 %v3305_v44  ;;  %v3771_v44 = vunpack.i.l.bf16 %v3325_v13 }
 0xfc9   :  { %v1657_v53 = vpop.f32.mrf.mxu1 }
 0xfca   :  { %v1658_v19 = vadd.f32 %v1657_v53, %v3359_v14  ;;  %1669 = vmax.xlane.f32.xlu1 %v1655_v26 }
 0xfcc   :  { %1671 = vmax.xlane.f32.xlu0 %v1658_v19 }
 0xfce   :  { %1675 = vmax.xlane.f32.xlu1 %v1666_v47 }
 0xfdf   :  { %2714 = vrot.lane.b32.xlu1 %v2713_v9, %s2924_s22 }
 0xfe2   :  { %2709 = vrot.lane.b32.xlu0 %v2708_v5, %s2924_s22 }
 0xfe3   :  { %2719 = vrot.lane.b32.xlu1 %v2718_v33, %s2924_s22 }
 0xfe7   :  { %2724 = vrot.lane.b32.xlu1 %v3765_v6, %s2924_s22  ;;  %v3776_v6 = vunpack.i.h.bf16 %v3377_v34 }
 0xfeb   :  { %2729 = vrot.lane.b32.xlu1 %v3766_v3, %s2924_s22 }
0x104f   :  { %v1674_v21 = vpop.xlane.xlu1 %1673 }
0x1050   :  { %v1679_v33 = vsub.f32 %v1663_v28, %v1674_v21 }
0x1052   :  { %v1685_v17 = vmul.f32 1.442695, %v1679_v33 }
0x1053   :  { %v1670_v43 = vpop.xlane.xlu1 %1669 }
0x1054   :  { %v1677_v14 = vsub.f32 %v1655_v26, %v1670_v43 }
0x1055   :  { %v1672_v4 = vpop.xlane.xlu0 %1671 }
0x1056   :  { %v1681_v20 = vmul.f32 1.442695, %v1677_v14  ;;  %v1678_v51 = vsub.f32 %v1658_v19, %v1672_v4  ;;  %v3775_v19 = vunpack.i.l.bf16 %v3377_v34  ;;  %v2751_v34 = vld [vmem:[#allocation5 + $0x88] sm:$0xff]  }
0x1057   :  { %v1676_v9 = vpop.xlane.xlu1 %1675 }
0x1058   :  { %v1683_v42 = vmul.f32 1.442695, %v1678_v51  ;;  %2812 = vpow2.f32 %v1681_v20  ;;  %v1680_v48 = vsub.f32 %v1666_v47, %v1676_v9 }
0x1059   :  { %v2710_v52 = vpop.permute.xlu0 %2709 }
0x105a   :  { %2814 = vpow2.f32 %v1683_v42  ;;  %v2712_v5 = vunpack.i.h.bf16 %v2710_v52  ;;  %v2711_v32 = vunpack.i.l.bf16 %v2710_v52  ;;  %v1687_v36 = vmul.f32 1.442695, %v1680_v48  ;;  %v2750_v42 = vld [vmem:[#allocation5 + $0x90] sm:$0xff]  }
0x105b   :  { %v2715_v60 = vpop.permute.xlu1 %2714  ;;  %2515 = vmatprep.subr.bf16.mxu0 %v2750_v42 }
0x105c   :  { %v2717_v49 = vunpack.i.h.bf16 %v2715_v60  ;;  %v2716_v11 = vunpack.i.l.bf16 %v2715_v60  ;;  %v1596_v50 = vsel %vm271_vm5, %v2711_v32, %v3767_v1  ;;  %v1597_v16 = vsel %vm271_vm5, %v2712_v5, %v3768_v46  ;;  %2516 = vmatpush3.bf16.msra.mxu0 %v2750_v42 }
0x105d   :  { %v1608_v29 = vpack.c.bf16 %v1597_v16, %v1596_v50  ;;  %2816 = vpow2.f32 %v1687_v36  ;;  %2517 = vmatprep.subr.bf16.mxu0 %v2751_v34 }
0x105e   :  { %v1594_v0 = vsel %vm271_vm5, %v2716_v11, %v3769_v25  ;;  %v1595_v31 = vsel %vm271_vm5, %v2717_v49, %v3770_v54  ;;  %2818 = vpow2.f32 %v1685_v17 }
0x105f   :  { %v2720_v8 = vpop.permute.xlu1 %2719  ;;  %v1607_v39 = vpack.c.bf16 %v1595_v31, %v1594_v0  ;;  %2501 = vmatprep.subr.bf16.mxu1 %v1608_v29 }
0x1060   :  { %v2722_v58 = vunpack.i.h.bf16 %v2720_v8  ;;  %v2721_v35 = vunpack.i.l.bf16 %v2720_v8  ;;  %2502 = vmatpush3.bf16.msra.mxu1 %v1608_v29  ;;  %2518 = vmatpush3.bf16.msra.mxu0 %v2751_v34 }
0x1061   :  { %2503 = vmatprep.subr.bf16.mxu1 %v1607_v39 }
0x1062   :  { %v1592_v22 = vsel %vm271_vm5, %v2721_v35, %v3771_v44  ;;  %v1593_v30 = vsel %vm271_vm5, %v2722_v58, %v3772_v38 }
0x1063   :  { %v2725_v12 = vpop.permute.xlu1 %2724  ;;  %v1606_v41 = vpack.c.bf16 %v1593_v30, %v1592_v22 }
0x1064   :  { %v2727_v61 = vunpack.i.h.bf16 %v2725_v12  ;;  %v2726_v23 = vunpack.i.l.bf16 %v2725_v12  ;;  %2504 = vmatpush3.bf16.msra.mxu1 %v1607_v39 }
0x1065   :  { %v2813_v10 = vpop.eup %2812  ;;  %2505 = vmatprep.subr.bf16.mxu1 %v1606_v41 }
0x1066   :  { %v1590_v15 = vsel %vm271_vm5, %v2726_v23, %v3773_v59  ;;  %v1591_v62 = vsel %vm271_vm5, %v2727_v61, %v3774_v63 }
0x1067   :  { %v2815_v28 = vpop.eup %2814  ;;  %v2730_v13 = vpop.permute.xlu1 %2729  ;;  %v1605_v56 = vpack.c.bf16 %v1591_v62, %v1590_v15 }
0x1068   :  { %v2732_v18 = vunpack.i.h.bf16 %v2730_v13  ;;  %v2731_v26 = vunpack.i.l.bf16 %v2730_v13  ;;  %v1689_v53 = vpack.c.bf16 %v2815_v28, %v2813_v10  ;;  %2506 = vmatpush3.bf16.msra.mxu1 %v1606_v41 }
0x1069   :  { %2507 = vmatprep.subr.bf16.mxu1 %v1605_v56 }
0x106a   :  { %2511 = vmatprep.mubr.bf16.mxu1 %v1689_v53  ;;  %v1588_v47 = vsel %vm271_vm5, %v2731_v26, %v3775_v19  ;;  %v1589_v3 = vsel %vm271_vm5, %v2732_v18, %v3776_v6  ;;  %v2817_v21 = vpop.eup %2816 }
0x106b   :  { %v1604_v45 = vpack.c.bf16 %v1589_v3, %v1588_v47  ;;  %v2819_v43 = vpop.eup %2818 }
0x106c   :  { %2508 = vmatpush3.bf16.msra.mxu1 %v1605_v56  ;;  %v1690_v14 = vpack.c.bf16 %v2817_v21, %v2819_v43  ;;  %v2753_v21 = vld [vmem:[#allocation5 + $0x98] sm:$0xff]  }
0x106d   :  { %2509 = vmatprep.subr.bf16.mxu1 %v1604_v45 }
0x1070   :  { %2510 = vmatpush3.bf16.msra.mxu1 %v1604_v45  ;;  %v2752_v45 = vld [vmem:[#allocation5 + $0xa0] sm:$0xff]  }
0x1071   :  { %2523 = vmatprep.subr.bf16.mxu0 %v2752_v45 }
0x1073   :  { %2512 = vmatmul.mubr.bf16.vlgmr.msra.gmra.mxu1 %v1690_v14 }
0x1133   :  { %v2513_v4 = vpop.f32.mrf.mxu1 }
0x1135   :  { %v1725_v20 = vpop.f32.mrf.mxu1 }
0x1136   :  { %2820 = vrcp.f32 %v1725_v20 }
0x1137   :  { %v2514_v51 = vpop.f32.mrf.mxu1  ;;  %2822 = vrcp.f32 %v2513_v4 }
0x1139   :  { %v1728_v9 = vpop.f32.mrf.mxu1 }
0x113a   :  { %2824 = vrcp.f32 %v1728_v9 }
0x113b   :  { %2826 = vrcp.f32 %v2514_v51 }
0x1143   :  { %v2821_v52 = vpop.eup %2820 }
0x1144   :  { %1748 = vrot.lane.b32.xlu1 %v2821_v52, %s2928_s0  ;;  %v2823_v48 = vpop.eup %2822 }
0x1147   :  { %v2825_v5 = vpop.eup %2824 }
0x1148   :  { %1752 = vrot.lane.b32.xlu1 %v2823_v48, %s2928_s0  ;;  %1750 = vrot.lane.b32.xlu0 %v2825_v5, %s2928_s0  ;;  %v2827_v32 = vpop.eup %2826 }
0x114c   :  { %1754 = vrot.lane.b32.xlu0 %v2827_v32, %s2928_s0  ;;  %1779 = vrot.lane.b32.xlu1 %v3469_v37, %s2929_s5 }
0x11b6   :  { %v1749_v60 = vpop.permute.xlu1 %1748 }
0x11b7   :  { %v1760_v49 = vmul.f32 %v1749_v60, %v1725_v20 }
0x11ba   :  { %v1751_v33 = vpop.permute.xlu0 %1750  ;;  %v1753_v1 = vpop.permute.xlu1 %1752 }
0x11bb   :  { %v1761_v11 = vmul.f32 %v1751_v33, %v1728_v9  ;;  %v1762_v16 = vmul.f32 %v2513_v4, %v1753_v1 }
0x11bd   :  { %v1764_v50 = vpack.c.bf16 %v1761_v11, %v1760_v49 }
0x11be   :  { %v1755_v46 = vpop.permute.xlu0 %1754  ;;  %v1780_v25 = vpop.permute.xlu1 %1779 }
0x11bf   :  { %v1763_v36 = vmul.f32 %v2514_v51, %v1755_v46  ;;  %2519 = vmatprep.mubr.msk.bf16.mxu0 %vm271_vm5, %v1764_v50 }
0x11c1   :  { %v1765_v29 = vpack.c.bf16 %v1763_v36, %v1762_v16 }
0x11c3   :  { %2520 = vmatmul.mubr.msk.bf16.vlgmr.msra.gmra.mxu0 %vm271_vm5, %v1765_v29 }
0x11c4   :  { %2524 = vmatpush3.bf16.msra.mxu0 %v2752_v45 }
0x11c5   :  { %2525 = vmatprep.subr.bf16.mxu0 %v2753_v21 }
0x11c8   :  { %2526 = vmatpush3.bf16.msra.mxu0 %v2753_v21 }
0x1283   :  { %v2521_v0 = vpop.f32.mrf.mxu0 }
0x1284   :  { %v1831_v31 = vadd.f32 %v2521_v0, %v1780_v25 }
0x1285   :  { %v1822_v54 = vpop.f32.mrf.mxu0 }
0x1286   :  { %v1823_v8 = vadd.f32 %v1822_v54, %v1780_v25  ;;  %v1839_v58 = vadd.f32 %v1831_v31, %v3453_v27 }
0x1287   :  { %v2522_v37 = vpop.f32.mrf.mxu0 }
0x1288   :  { %v1837_v39 = vadd.f32 %v1823_v8, %v3457_v40  ;;  %v1834_v35 = vadd.f32 %v2522_v37, %v1780_v25  ;;  %v1847_v41 = vsel %vm271_vm5, %v1839_v58, 0.0 }
0x1289   :  { %v1825_v17 = vpop.f32.mrf.mxu0 }
0x128a   :  { %v1826_v44 = vadd.f32 %v1825_v17, %v1780_v25  ;;  %v1841_v22 = vsel %vm271_vm5, %v1837_v39, 0.0  ;;  %v1840_v30 = vadd.f32 %v1834_v35, %v3455_v2  ;;  %v2754_v35 = vld [vmem:[#allocation5 + $0xe0] sm:$0xff]  }
0x128b   :  { %1842 = vadd.xlane.f32.xlu0 %v1841_v22  ;;  %2531 = vmatprep.subr.bf16.mxu0 %v2754_v35  ;;  %v2756_v22 = vld [vmem:[#allocation5 + $0xd0] sm:$0xff]  }
0x128c   :  { %v1838_v38 = vadd.f32 %v1826_v44, %v3459_v24  ;;  %v1850_v40 = vsel %vm271_vm5, %v1840_v30, 0.0  ;;  %v2755_v44 = vld [vmem:[#allocation5 + $0xd8] sm:$0xff]  }
0x128e   :  { %v1844_v12 = vsel %vm271_vm5, %v1838_v38, 0.0 }
0x128f   :  { %1845 = vadd.xlane.f32.xlu1 %v1844_v12  ;;  %1848 = vadd.xlane.f32.xlu0 %v1847_v41  ;;  %v2759_v12 = vld [vmem:[#allocation5 + $0xb8] sm:$0xff]   ;;  %v2760_v41 = vld [vmem:[#allocation5 + $0xb0] sm:$0xff]  }
0x1293   :  { %1851 = vadd.xlane.f32.xlu0 %v1850_v40  ;;  %v2761_v40 = vld [vmem:[#allocation5 + $0xa8] sm:$0xff]  }
0x1314   :  { %v1843_v61 = vpop.xlane.xlu0 %1842 }
0x1315   :  { %v1853_v27 = vmul.f32 0.03125, %v1843_v61  ;;  %v1911_v61 = vsub.s32 6, %v2995_v55 }
0x1317   :  { %v1857_v63 = vsub.f32 %v1837_v39, %v1853_v27  ;;  %v1912_v27 = vrot.slane %v3426_v7, %v1911_v61 }
0x1318   :  { %v1846_v23 = vpop.xlane.xlu1 %1845  ;;  %v1849_v10 = vpop.xlane.xlu0 %1848 }
0x1319   :  { %v1854_v59 = vmul.f32 0.03125, %v1846_v23  ;;  %v1855_v15 = vmul.f32 0.03125, %v1849_v10  ;;  %v1861_v19 = vmul.f32 %v1857_v63, %v1857_v63 }
0x131b   :  { %v1858_v62 = vsub.f32 %v1838_v38, %v1854_v59  ;;  %v1859_v24 = vsub.f32 %v1839_v58, %v1855_v15  ;;  %v1865_v6 = vsel %vm271_vm5, %v1861_v19, 0.0  ;;  %v2757_v38 = vld [vmem:[#allocation5 + $0xc8] sm:$0xff]  }
0x131c   :  { %v1852_v28 = vpop.xlane.xlu0 %1851 }
0x131d   :  { %v1856_v2 = vmul.f32 0.03125, %v1852_v28  ;;  %v1862_v13 = vmul.f32 %v1858_v62, %v1858_v62  ;;  %v1863_v56 = vmul.f32 %v1859_v24, %v1859_v24 }
0x131f   :  { %v1860_v18 = vsub.f32 %v1840_v30, %v1856_v2  ;;  %v1868_v26 = vsel %vm271_vm5, %v1862_v13, 0.0  ;;  %v1871_v53 = vsel %vm271_vm5, %v1863_v56, 0.0  ;;  %v2758_v30 = vld [vmem:[#allocation5 + $0xc0] sm:$0xff]  }
0x1320   :  { %1869 = vadd.xlane.f32.xlu0 %v1868_v26  ;;  %1872 = vadd.xlane.f32.xlu1 %v1871_v53 }
0x1321   :  { %v1864_v47 = vmul.f32 %v1860_v18, %v1860_v18 }
0x1323   :  { %v1874_v3 = vsel %vm271_vm5, %v1864_v47, 0.0 }
0x1324   :  { %1866 = vadd.xlane.f32.xlu1 %v1865_v6  ;;  %1875 = vadd.xlane.f32.xlu0 %v1874_v3 }
0x1335   :  { %1893 = vrot.lane.b32.xlu1 %v3445_v57, %s2924_s22 }
0x133a   :  { %1900 = vrot.lane.b32.xlu0 %v3445_v57, %s2929_s5 }
0x13a9   :  { %v1873_v43 = vpop.xlane.xlu1 %1872  ;;  %v1870_v14 = vpop.xlane.xlu0 %1869 }
0x13aa   :  { %v1879_v4 = vmul.f32 0.03125, %v1873_v43  ;;  %v1878_v20 = vmul.f32 0.03125, %v1870_v14 }
0x13ac   :  { %v1883_v51 = vadd.f32 1e-05, %v1879_v4  ;;  %v1882_v9 = vadd.f32 1e-05, %v1878_v20 }
0x13ad   :  { %v1867_v42 = vpop.xlane.xlu1 %1866  ;;  %v1876_v34 = vpop.xlane.xlu0 %1875 }
0x13ae   :  { %2828 = vrsqrt.f32 %v1883_v51  ;;  %v1877_v52 = vmul.f32 0.03125, %v1867_v42  ;;  %v1880_v48 = vmul.f32 0.03125, %v1876_v34 }
0x13af   :  { %2830 = vrsqrt.f32 %v1882_v9 }
0x13b0   :  { %v1881_v5 = vadd.f32 1e-05, %v1877_v52  ;;  %v1884_v57 = vadd.f32 1e-05, %v1880_v48  ;;  %v2004_v48 = vsub.s32 7, %v2995_v55 }
0x13b1   :  { %v1894_v49 = vpop.permute.xlu1 %1893  ;;  %v1901_v25 = vpop.permute.xlu0 %1900 }
0x13b2   :  { %2832 = vrsqrt.f32 %v1881_v5  ;;  %v2853_v5 = vld [vmem:[#allocation2 + $0x20] sm:$0xff] }
0x13b3   :  { %2834 = vrsqrt.f32 %v1884_v57  ;;  %v2005_v57 = vrot.slane %v2853_v5, %v2004_v48 }
0x13bb   :  { %v2829_v32 = vpop.eup %2828 }
0x13bc   :  { %v2831_v60 = vpop.eup %2830  ;;  %v1891_v33 = vmul.f32 %v2829_v32, %v1859_v24 }
0x13bd   :  { %v1890_v11 = vmul.f32 %v2831_v60, %v1858_v62 }
0x13be   :  { %v1898_v29 = vmul.f32 %v1894_v49, %v1891_v33 }
0x13bf   :  { %v2833_v1 = vpop.eup %2832  ;;  %v1897_v16 = vmul.f32 %v1894_v49, %v1890_v11 }
0x13c0   :  { %v2835_v50 = vpop.eup %2834  ;;  %v1889_v46 = vmul.f32 %v2833_v1, %v1857_v63  ;;  %v3693_v37 = vadd.f32 %v1901_v25, %v1898_v29 }
0x13c1   :  { %v1892_v36 = vmul.f32 %v2835_v50, %v1860_v18  ;;  %v3691_v8 = vadd.f32 %v1901_v25, %v1897_v16 }
0x13c2   :  { %v1896_v0 = vmul.f32 %v1894_v49, %v1889_v46 }
0x13c3   :  { %v1899_v54 = vmul.f32 %v1894_v49, %v1892_v36 }
0x13c4   :  { %v3689_v31 = vadd.f32 %v1901_v25, %v1896_v0 }
0x13c5   :  { %v3695_v39 = vadd.f32 %v1901_v25, %v1899_v54 }
0x13c6   :  { %v1907_v17 = vpack.c.bf16 %v3691_v8, %v3689_v31 }
0x13c7   :  { %v1908_v58 = vpack.c.bf16 %v3695_v39, %v3693_v37 }
0x13c8   :  { %2527 = vmatprep.mubr.msk.bf16.mxu0 %vm271_vm5, %v1907_v17 }
0x13c9   :  { %2528 = vmatmul.mubr.msk.bf16.vlgmr.msra.gmra.mxu0 %vm271_vm5, %v1908_v58 }
0x13ca   :  { %2532 = vmatpush3.bf16.msra.mxu0 %v2754_v35 }
0x13cb   :  { %2533 = vmatprep.subr.bf16.mxu0 %v2755_v44 }
0x13ce   :  { %2534 = vmatpush3.bf16.msra.mxu0 %v2755_v44 }
0x13cf   :  { %2535 = vmatprep.subr.bf16.mxu0 %v2756_v22 }
0x13d2   :  { %2536 = vmatpush3.bf16.msra.mxu0 %v2756_v22 }
0x13d3   :  { %2537 = vmatprep.subr.bf16.mxu0 %v2757_v38 }
0x13d6   :  { %2538 = vmatpush3.bf16.msra.mxu0 %v2757_v38 }
0x13d7   :  { %2539 = vmatprep.subr.bf16.mxu0 %v2758_v30 }
0x13da   :  { %2540 = vmatpush3.bf16.msra.mxu0 %v2758_v30 }
0x13db   :  { %2541 = vmatprep.subr.bf16.mxu0 %v2759_v12 }
0x13de   :  { %2542 = vmatpush3.bf16.msra.mxu0 %v2759_v12 }
0x13df   :  { %2543 = vmatprep.subr.bf16.mxu0 %v2760_v41 }
0x13e2   :  { %2544 = vmatpush3.bf16.msra.mxu0 %v2760_v41 }
0x13e3   :  { %2545 = vmatprep.subr.bf16.mxu0 %v2761_v40 }
0x13e6   :  { %2546 = vmatpush3.bf16.msra.mxu0 %v2761_v40 }
0x1489   :  { %v2529_v23 = vpop.f32.mrf.mxu0 }
0x148a   :  { %v1974_v10 = vadd.f32 %v2529_v23, %v1912_v27 }
0x148b   :  { %v1965_v59 = vpop.f32.mrf.mxu0 }
0x148c   :  { %v1966_v15 = vadd.f32 %v1965_v59, %v1912_v27  ;;  %v1986_v63 = vmul.f32 0.70710677, %v1974_v10  ;;  %v1982_v4 = vmul.f32 0.5, %v1974_v10 }
0x148d   :  { %v2530_v62 = vpop.f32.mrf.mxu0 }
0x148e   :  { %v1984_v24 = vmul.f32 0.70710677, %v1966_v15  ;;  %v1977_v28 = vadd.f32 %v2530_v62, %v1912_v27  ;;  %v1980_v21 = vmul.f32 0.5, %v1966_v15  ;;  %v2317_v62 = vld [vmem:[#allocation2 + $0x28] ss:$0 sm:$0xff] }
0x148f   :  { %v1968_v2 = vpop.f32.mrf.mxu0 }
0x1490   :  { %2836 = verf.f32 %v1984_v24  ;;  %v1987_v13 = vmul.f32 0.70710677, %v1977_v28  ;;  %v1969_v56 = vadd.f32 %v1968_v2, %v1912_v27  ;;  %v1983_v45 = vmul.f32 0.5, %v1977_v28  ;;  %v2762_v24 = vld [vmem:[#allocation5 + $0xf0] sm:$0xff]   ;;  %v2763_v28 = vld [vmem:[#allocation5 + $0xe8] sm:$0xff]  }
0x1491   :  { %2838 = verf.f32 %v1986_v63  ;;  %2551 = vmatprep.subr.bf16.mxu1 %v2762_v24 }
0x1492   :  { %2840 = verf.f32 %v1987_v13  ;;  %v1985_v18 = vmul.f32 0.70710677, %v1969_v56  ;;  %v1981_v43 = vmul.f32 0.5, %v1969_v56  ;;  %2552 = vmatpush3.bf16.msra.mxu1 %v2762_v24 }
0x1493   :  { %2553 = vmatprep.subr.bf16.mxu1 %v2763_v28 }
0x1494   :  { %2842 = verf.f32 %v1985_v18 }
0x1496   :  { %2554 = vmatpush3.bf16.msra.mxu1 %v2763_v28 }
0x149d   :  { %v2837_v26 = vpop.eup %2836 }
0x149e   :  { %v2839_v53 = vpop.eup %2838  ;;  %v1992_v7 = vadd.f32 1.0, %v2837_v26 }
0x149f   :  { %v2841_v19 = vpop.eup %2840  ;;  %v1994_v3 = vadd.f32 1.0, %v2839_v53 }
0x14a0   :  { %v1995_v47 = vadd.f32 1.0, %v2841_v19  ;;  %v1996_v51 = vmul.f32 %v1992_v7, %v1980_v21 }
0x14a1   :  { %v2843_v6 = vpop.eup %2842  ;;  %v1998_v42 = vmul.f32 %v1994_v3, %v1982_v4 }
0x14a2   :  { %v1993_v14 = vadd.f32 1.0, %v2843_v6  ;;  %v1999_v20 = vmul.f32 %v1995_v47, %v1983_v45 }
0x14a4   :  { %v1997_v9 = vmul.f32 %v1993_v14, %v1981_v43  ;;  %v2001_v52 = vpack.c.bf16 %v1999_v20, %v1998_v42 }
0x14a6   :  { %v2000_v34 = vpack.c.bf16 %v1997_v9, %v1996_v51 }
0x14a8   :  { %2547 = vmatprep.mubr.bf16.mxu0 %v2000_v34 }
0x14a9   :  { %2548 = vmatmul.mubr.bf16.vlgmr.msra.gmra.mxu0 %v2001_v52 }
0x1569   :  { %v2549_v32 = vpop.f32.mrf.mxu0 }
0x156a   :  { %v2097_v33 = vadd.f32 %v2549_v32, %v2005_v57 }
0x156b   :  { %v2088_v60 = vpop.f32.mrf.mxu0 }
0x156c   :  { %v2089_v49 = vadd.f32 %v2088_v60, %v2005_v57  ;;  %v2105_v46 = vadd.f32 %v2097_v33, %v3693_v37 }
0x156d   :  { %v2550_v11 = vpop.f32.mrf.mxu0 }
0x156e   :  { %v2103_v1 = vadd.f32 %v2089_v49, %v3689_v31  ;;  %v2100_v16 = vadd.f32 %v2550_v11, %v2005_v57  ;;  %v2113_v54 = vsel %vm271_vm5, %v2105_v46, 0.0 }
0x156f   :  { %v2091_v50 = vpop.f32.mrf.mxu0 }
0x1570   :  { %v2092_v36 = vadd.f32 %v2091_v50, %v2005_v57  ;;  %v2107_v29 = vsel %vm271_vm5, %v2103_v1, 0.0  ;;  %v2106_v55 = vadd.f32 %v2100_v16, %v3695_v39 }
0x1571   :  { %2108 = vadd.xlane.f32.xlu1 %v2107_v29 }
0x1572   :  { %v2104_v25 = vadd.f32 %v2092_v36, %v3691_v8  ;;  %v2116_v31 = vsel %vm271_vm5, %v2106_v55, 0.0 }
0x1574   :  { %v2110_v0 = vsel %vm271_vm5, %v2104_v25, 0.0 }
0x1575   :  { %2111 = vadd.xlane.f32.xlu0 %v2110_v0  ;;  %2114 = vadd.xlane.f32.xlu1 %v2113_v54 }
0x1579   :  { %2117 = vadd.xlane.f32.xlu0 %v2116_v31 }
0x15fa   :  { %v2109_v17 = vpop.xlane.xlu1 %2108 }
0x15fb   :  { %v2119_v37 = vmul.f32 0.03125, %v2109_v17 }
0x15fd   :  { %v2123_v38 = vsub.f32 %v2103_v1, %v2119_v37 }
0x15fe   :  { %v2112_v58 = vpop.xlane.xlu0 %2111  ;;  %v2115_v35 = vpop.xlane.xlu1 %2114 }
0x15ff   :  { %v2120_v44 = vmul.f32 0.03125, %v2112_v58  ;;  %v2121_v22 = vmul.f32 0.03125, %v2115_v35  ;;  %v2127_v10 = vmul.f32 %v2123_v38, %v2123_v38 }
0x1601   :  { %v2124_v30 = vsub.f32 %v2104_v25, %v2120_v44  ;;  %v2125_v8 = vsub.f32 %v2105_v46, %v2121_v22  ;;  %v2131_v63 = vsel %vm271_vm5, %v2127_v10, 0.0 }
0x1602   :  { %v2118_v12 = vpop.xlane.xlu0 %2117 }
0x1603   :  { %v2122_v39 = vmul.f32 0.03125, %v2118_v12  ;;  %v2128_v41 = vmul.f32 %v2124_v30, %v2124_v30  ;;  %v2129_v40 = vmul.f32 %v2125_v8, %v2125_v8 }
0x1605   :  { %v2126_v61 = vsub.f32 %v2106_v55, %v2122_v39  ;;  %v2134_v27 = vsel %vm271_vm5, %v2128_v41, 0.0  ;;  %v2137_v23 = vsel %vm271_vm5, %v2129_v40, 0.0 }
0x1606   :  { %2135 = vadd.xlane.f32.xlu0 %v2134_v27  ;;  %2138 = vadd.xlane.f32.xlu1 %v2137_v23 }
0x1607   :  { %v2130_v59 = vmul.f32 %v2126_v61, %v2126_v61 }
0x1609   :  { %v2140_v15 = vsel %vm271_vm5, %v2130_v59, 0.0 }
0x160a   :  { %2141 = vadd.xlane.f32.xlu0 %v2140_v15  ;;  %2132 = vadd.xlane.f32.xlu1 %v2131_v63 }
0x161b   :  { %2168 = vrot.lane.b32.xlu1 %v2317_v62, %s2928_s0 }
0x168f   :  { %v2136_v2 = vpop.xlane.xlu0 %2135  ;;  %v2139_v13 = vpop.xlane.xlu1 %2138 }
0x1690   :  { %v2144_v56 = vmul.f32 0.03125, %v2136_v2  ;;  %v2145_v18 = vmul.f32 0.03125, %v2139_v13 }
0x1692   :  { %v2148_v26 = vadd.f32 1e-05, %v2144_v56  ;;  %v2149_v53 = vadd.f32 1e-05, %v2145_v18 }
0x1693   :  { %v2142_v19 = vpop.xlane.xlu0 %2141  ;;  %v2133_v7 = vpop.xlane.xlu1 %2132 }
0x1694   :  { %2844 = vrsqrt.f32 %v2148_v26  ;;  %v2146_v47 = vmul.f32 0.03125, %v2142_v19  ;;  %v2143_v6 = vmul.f32 0.03125, %v2133_v7 }
0x1695   :  { %2846 = vrsqrt.f32 %v2149_v53 }
0x1696   :  { %v2150_v3 = vadd.f32 1e-05, %v2146_v47  ;;  %v2147_v45 = vadd.f32 1e-05, %v2143_v6 }
0x1697   :  { %v2169_v48 = vpop.permute.xlu1 %2168 }
0x1698   :  { %2848 = vrsqrt.f32 %v2150_v3 }
0x1699   :  { %2850 = vrsqrt.f32 %v2147_v45 }
0x16a1   :  { %v2845_v21 = vpop.eup %2844 }
0x16a2   :  { %v2847_v43 = vpop.eup %2846  ;;  %v2156_v14 = vmul.f32 %v2845_v21, %v2124_v30 }
0x16a3   :  { %v2157_v4 = vmul.f32 %v2847_v43, %v2125_v8 }
0x16a4   :  { %v2164_v52 = vmul.f32 %v2317_v62, %v2156_v14 }
0x16a5   :  { %v2849_v20 = vpop.eup %2848  ;;  %v2165_v42 = vmul.f32 %v2317_v62, %v2157_v4 }
0x16a6   :  { %v2851_v51 = vpop.eup %2850  ;;  %v2158_v9 = vmul.f32 %v2849_v20, %v2126_v61  ;;  %v2172_v49 = vadd.f32 %v2169_v48, %v2164_v52 }
0x16a7   :  { %v2155_v34 = vmul.f32 %v2851_v51, %v2123_v38  ;;  %v2173_v32 = vadd.f32 %v2169_v48, %v2165_v42 }
0x16a8   :  { %v2166_v5 = vmul.f32 %v2317_v62, %v2158_v9 }
0x16a9   :  { %v2163_v57 = vmul.f32 %v2317_v62, %v2155_v34 }
0x16aa   :  { %v2174_v60 = vadd.f32 %v2169_v48, %v2166_v5 }
0x16ab   :  { %v2171_v33 = vadd.f32 %v2169_v48, %v2163_v57 }
0x16ac   :  { %v2180_v11 = vpack.c.bf16 %v2174_v60, %v2173_v32 }
0x16ad   :  { %v2179_v1 = vpack.c.bf16 %v2172_v49, %v2171_v33 }
0x16af   :  { %2555 = vmatprep.mubr.msk.bf16.mxu1 %vm271_vm5, %v2179_v1 }
0x16b0   :  { %2556 = vmatmul.mubr.msk.bf16.vlgmr.msra.gmra.mxu1 %vm271_vm5, %v2180_v11 }
0x1770   :  { %v2557_v50 = vpop.f32.mrf.mxu1 }
0x1771   :  { %2250 = vst [vmem:[#allocation7 + $0x10] sm:$0xff] %v2557_v50 }
0x1772   :  { %v2233_v46 = vpop.f32.mrf.mxu1 }
0x1773   :  { %2248 = vst [vmem:[#allocation7] sm:$0xff] %v2233_v46 }
0x1774   :  { %v2558_v16 = vpop.f32.mrf.mxu1 }
0x1775   :  { %2251 = vst [vmem:[#allocation7 + $0x18] sm:$0xff] %v2558_v16 }
0x1776   :  { %v2236_v36 = vpop.f32.mrf.mxu1 }
0x1777   :  { %2249 = vst [vmem:[#allocation7 + $0x8] sm:$0xff] %v2236_v36 }
0x1778   :  { %2905 = shalt.err (!%p2902_p0)
}
0x1779   :  { %2263 = dma.vmem_to_hbm [thread:$0]  %s2258_s7, 512, %s3730_s3, [#allocation4], %s2921_s15, %s2921_s15, %s2922_s16  }
0x177a   :  { %2918 = dma.done.wait [#allocation4], 512  }
0x177b   :  { %2919 = vsyncadd [#allocation4], 4294966784 }
0x177c   :  { %2267 = vsyncpa [#allocation3], 1 }
0x177d   :  { %2268 = vsyncpa [#allocation6], 1 }
0x177e   :  { %2269 = vsyncpa [#allocation4], 1 }

</bundles_post_ra>
